<compile_context>
chip_gen: v7x
topology: tpu7x:2x2x1
jax: 0.10.0
libtpu: 0.0.40
codegen_flags: <defaults>
</compile_context>

<pallas_src>
import functools
from typing import NamedTuple, Tuple

import jax
import jax.numpy as jnp
from jax.experimental import pallas as pl
from jax.experimental.pallas import tpu as pltpu

LANE = 128


def _round_up(x, m):
    return ((x + m - 1) // m) * m


class VAEConfig(NamedTuple):
    enc_layer_sizes: Tuple[int, ...]   # e.g. (784, 256); first entry = raw x width
    latent_size: int
    dec_layer_sizes: Tuple[int, ...]   # e.g. (256, 784)
    conditional: bool
    num_labels: int


# ----------------------------------------------------------------------------
# Parameter init (nn.Linear-style), padded / split / fused once, bf16 weights.
# ----------------------------------------------------------------------------
def _uniform_linear(key, in_d, out_d):
    kw, kb = jax.random.split(key)
    bound = 1.0 / (in_d ** 0.5)
    w = jax.random.uniform(kw, (in_d, out_d), jnp.float32, -bound, bound)
    b = jax.random.uniform(kb, (out_d,), jnp.float32, -bound, bound)
    return w, b


def init_vae_params(key, cfg: VAEConfig):
    assert len(cfg.enc_layer_sizes) >= 2 and len(cfg.dec_layer_sizes) >= 1
    extra = cfg.num_labels if cfg.conditional else 0
    if cfg.conditional:
        assert cfg.num_labels <= LANE, "label one-hot must fit one 128-lane slab"
    x_width = cfg.enc_layer_sizes[0]
    x_pad = _round_up(x_width, LANE)
    latent = cfg.latent_size
    lat_pad = _round_up(latent, LANE)

    enc_hidden = list(cfg.enc_layer_sizes[1:])
    dec_sizes = list(cfg.dec_layer_sizes)

    params = {}

    # --- encoder layer 0: (x_width + extra) -> enc_hidden[0]; split image/label rows.
    key, k = jax.random.split(key)
    w, b = _uniform_linear(k, x_width + extra, enc_hidden[0])
    h1_pad = _round_up(enc_hidden[0], LANE)
    w0x = jnp.zeros((x_pad, h1_pad), jnp.float32).at[:x_width, :enc_hidden[0]].set(
        w[:x_width]).astype(jnp.bfloat16)
    b0 = jnp.zeros((1, h1_pad), jnp.float32).at[0, :enc_hidden[0]].set(b)
    params["enc0"] = (w0x, b0)
    if cfg.conditional:
        w0c = jnp.zeros((LANE, h1_pad), jnp.float32).at[:extra, :enc_hidden[0]].set(
            w[x_width:]).astype(jnp.bfloat16)
        params["enc0_c"] = w0c

    # --- remaining encoder layers (standard lane-padded dense).
    rest = []
    for in_d, out_d in zip(enc_hidden[:-1], enc_hidden[1:]):
        key, k = jax.random.split(key)
        w, b = _uniform_linear(k, in_d, out_d)
        ip, op = _round_up(in_d, LANE), _round_up(out_d, LANE)
        wp = jnp.zeros((ip, op), jnp.float32).at[:in_d, :out_d].set(w).astype(jnp.bfloat16)
        b_p = jnp.zeros((1, op), jnp.float32).at[0, :out_d].set(b)
        rest.append((wp, b_p))
    params["enc_rest"] = rest

    # --- fused mean | logvar head: one (hid_pad, 2*lat_pad) weight (N=256 matmul).
    hid = enc_hidden[-1]
    hid_pad = _round_up(hid, LANE)
    key, km, kv = jax.random.split(key, 3)
    wm, bm = _uniform_linear(km, hid, latent)
    wv, bv = _uniform_linear(kv, hid, latent)
    wh = jnp.zeros((hid_pad, 2 * lat_pad), jnp.float32)
    wh = wh.at[:hid, :latent].set(wm).at[:hid, lat_pad:lat_pad + latent].set(wv)
    bh = jnp.zeros((1, 2 * lat_pad), jnp.float32)
    bh = bh.at[0, :latent].set(bm).at[0, lat_pad:lat_pad + latent].set(bv)
    params["head"] = (wh.astype(jnp.bfloat16), bh)

    # --- decoder layer 0: (latent + extra) -> dec_sizes[0]; split z/label rows.
    #     z-rows above `latent` are zero, so padded z lanes can never leak.
    key, k = jax.random.split(key)
    w, b = _uniform_linear(k, latent + extra, dec_sizes[0])
    d1_pad = _round_up(dec_sizes[0], LANE)
    wd0z = jnp.zeros((lat_pad, d1_pad), jnp.float32).at[:latent, :dec_sizes[0]].set(
        w[:latent]).astype(jnp.bfloat16)
    bd0 = jnp.zeros((1, d1_pad), jnp.float32).at[0, :dec_sizes[0]].set(b)
    params["dec0"] = (wd0z, bd0)
    if cfg.conditional:
        wd0c = jnp.zeros((LANE, d1_pad), jnp.float32).at[:extra, :dec_sizes[0]].set(
            w[latent:]).astype(jnp.bfloat16)
        params["dec0_c"] = wd0c

    # --- remaining decoder layers.
    rest = []
    for in_d, out_d in zip(dec_sizes[:-1], dec_sizes[1:]):
        key, k = jax.random.split(key)
        w, b = _uniform_linear(k, in_d, out_d)
        ip, op = _round_up(in_d, LANE), _round_up(out_d, LANE)
        wp = jnp.zeros((ip, op), jnp.float32).at[:in_d, :out_d].set(w).astype(jnp.bfloat16)
        b_p = jnp.zeros((1, op), jnp.float32).at[0, :out_d].set(b)
        rest.append((wp, b_p))
    params["dec_rest"] = rest
    return params


# ----------------------------------------------------------------------------
# Fused VAE kernel (one batch tile per grid step).
# ----------------------------------------------------------------------------
def _make_vae_kernel(n_enc_rest, n_dec_rest, conditional):
    def kernel(*refs):
        it = iter(refs)
        x_ref = next(it)
        c_ref = next(it) if conditional else None
        eps_ref = next(it)
        w0x = next(it); b0 = next(it)
        w0c = next(it) if conditional else None
        enc_rest = [(next(it), next(it)) for _ in range(n_enc_rest)]
        wh = next(it); bh = next(it)
        wd0z = next(it); bd0 = next(it)
        wd0c = next(it) if conditional else None
        dec_rest = [(next(it), next(it)) for _ in range(n_dec_rest)]
        recon_ref = next(it)
        stats_ref = next(it)

        def mm(a, w_ref):
            # bf16 MXU operands, f32 accumulation.
            return jnp.dot(a.astype(jnp.bfloat16), w_ref[...],
                           preferred_element_type=jnp.float32)

        tb = x_ref.shape[0]
        onehot = None
        if conditional:
            c = c_ref[...]                                          # (tb, 1) int32
            lanes = jax.lax.broadcasted_iota(jnp.int32, (tb, LANE), 1)
            # Single 128-lane label slab; label j lives in lane j.
            onehot = (lanes == c).astype(jnp.bfloat16)

        # ---------------- Encoder ----------------
        h = mm(x_ref[...], w0x)                                     # image part
        if conditional:                                             # label part (tiny matmul)
            h = h + jnp.dot(onehot, w0c[...], preferred_element_type=jnp.float32)
        h = jnp.maximum(h + b0[...], 0.0)                           # bias + ReLU
        for w, b in enc_rest:
            h = jnp.maximum(mm(h, w) + b[...], 0.0)

        # Fused mean|logvar head: one N=2*lat_pad matmul, slice at a 128 boundary.
        mv = mm(h, wh) + bh[...]
        lat_pad = mv.shape[1] // 2
        means = mv[:, :lat_pad]
        log_var = mv[:, lat_pad:]

        # ------------- Reparameterize -------------
        z = means + eps_ref[...] * jnp.exp(0.5 * log_var)           # padded lanes stay 0

        # ---------------- Decoder ----------------
        d = mm(z, wd0z)                                             # z part
        if conditional:                                             # label part
            d = d + jnp.dot(onehot, wd0c[...], preferred_element_type=jnp.float32)
        d = d + bd0[...]
        if n_dec_rest > 0:
            d = jnp.maximum(d, 0.0)
            for li, (w, b) in enumerate(dec_rest):
                d = mm(d, w) + b[...]
                if li + 1 < n_dec_rest:
                    d = jnp.maximum(d, 0.0)
        d = 1.0 / (1.0 + jnp.exp(-d))                               # exact sigmoid

        recon_ref[...] = d.astype(recon_ref.dtype)                  # bf16 lane-dense store
        stats_ref[...] = jnp.concatenate([means, log_var, z], axis=-1)

    return kernel


# ----------------------------------------------------------------------------
# Wrapper: batch tiling, padding, pallas_call.
# ----------------------------------------------------------------------------
@functools.partial(jax.jit, static_argnames=("cfg",))
def vae_forward(x, c, eps, params, *, cfg: VAEConfig):
    B = x.shape[0]
    x2 = x.reshape(B, -1).astype(jnp.float32)                       # x.view(-1, 28*28)
    x_width = cfg.enc_layer_sizes[0]
    assert x2.shape[1] == x_width
    x_pad = _round_up(x_width, LANE)
    latent = cfg.latent_size
    lat_pad = _round_up(latent, LANE)
    dec_out = cfg.dec_layer_sizes[-1]
    dec_out_pad = _round_up(dec_out, LANE)

    # Batch tile: large tiles amortize the ~0.35us fixed per-grid-step overhead;
    # for large B keep >= 2 grid steps so ("parallel",) can use both v7x TCs.
    # bf16 activation I/O needs tb % 16 == 0.
    if B >= 256:
        tb = min(512, _round_up((B + 1) // 2, LANE))
    else:
        tb = _round_up(max(B, 1), 16)
    bp_rows = _round_up(B, tb)

    # Pad + bf16-cast in ONE fused op (no separate f32 padded copy); labels are
    # NOT concatenated here — they get a dedicated 128-lane slab in the kernel.
    xp = jnp.zeros((bp_rows, x_pad), jnp.bfloat16).at[:B, :x_width].set(
        x2.astype(jnp.bfloat16))
    # eps padding MUST stay zero so z's padded lanes are exactly zero.
    epsp = jnp.zeros((bp_rows, lat_pad), jnp.float32).at[:B, :latent].set(
        eps.astype(jnp.float32))

    inputs = [xp]
    in_specs = [pl.BlockSpec((tb, x_pad), lambda i: (i, 0))]
    if cfg.conditional:
        cp = jnp.zeros((bp_rows, 1), jnp.int32).at[:B, 0].set(c.astype(jnp.int32))
        inputs.append(cp)
        in_specs.append(pl.BlockSpec((tb, 1), lambda i: (i, 0)))
    inputs.append(epsp)
    in_specs.append(pl.BlockSpec((tb, lat_pad), lambda i: (i, 0)))

    def add_param(arr):
        # Same block every grid step -> parameters stay resident in VMEM.
        # (pl.Buffered(1) would single-buffer them; skipped — total VMEM use is
        #  far below the 32 MiB scoped limit even at tb=512.)
        inputs.append(arr)
        in_specs.append(pl.BlockSpec(arr.shape, lambda i: (0, 0)))

    w0x, b0 = params["enc0"]; add_param(w0x); add_param(b0)
    if cfg.conditional:
        add_param(params["enc0_c"])
    for w, b in params["enc_rest"]:
        add_param(w); add_param(b)
    wh, bh = params["head"]; add_param(wh); add_param(bh)
    wd0z, bd0 = params["dec0"]; add_param(wd0z); add_param(bd0)
    if cfg.conditional:
        add_param(params["dec0_c"])
    for w, b in params["dec_rest"]:
        add_param(w); add_param(b)

    out_shape = (
        jax.ShapeDtypeStruct((bp_rows, dec_out_pad), jnp.bfloat16),   # recon_x (bf16 I/O)
        jax.ShapeDtypeStruct((bp_rows, 3 * lat_pad), jnp.float32),    # means | log_var | z
    )
    out_specs = (
        pl.BlockSpec((tb, dec_out_pad), lambda i: (i, 0)),
        pl.BlockSpec((tb, 3 * lat_pad), lambda i: (i, 0)),
    )

    kernel = _make_vae_kernel(
        n_enc_rest=len(params["enc_rest"]),
        n_dec_rest=len(params["dec_rest"]),
        conditional=cfg.conditional)

    recon_p, stats = pl.pallas_call(
        kernel,
        grid=(bp_rows // tb,),
        in_specs=in_specs,
        out_specs=out_specs,
        out_shape=out_shape,
        compiler_params=pltpu.CompilerParams(
            dimension_semantics=("parallel",),     # shard batch tiles over v7x TCs
            vmem_limit_bytes=32 * 1024 * 1024,     # safe on v5e / v6e / v7x
        ),
    )(*inputs)

    # Padded batch rows (c=0) carry garbage/spurious values; sliced off here and
    # must never be reduced over.
    recon = recon_p[:B, :dec_out]                       # bf16 reconstruction
    means = stats[:B, :latent]
    log_var = stats[:B, lat_pad:lat_pad + latent]
    z = stats[:B, 2 * lat_pad:2 * lat_pad + latent]
    return recon, means, log_var, z


# ----------------------------------------------------------------------------
# Plain-JAX reference (same bf16 weights/matmul operands, exact sigmoid).
# ----------------------------------------------------------------------------
def reference_vae(x, c, eps, params, cfg: VAEConfig):
    B = x.shape[0]
    x = x.reshape(B, -1).astype(jnp.float32)
    x_width = cfg.enc_layer_sizes[0]
    latent = cfg.latent_size
    lat_pad = _round_up(latent, LANE)

    def mm(a, w):
        return jnp.dot(a.astype(jnp.bfloat16), w, preferred_element_type=jnp.float32)

    onehot = None
    if cfg.conditional:
        onehot = jax.nn.one_hot(c, cfg.num_labels, dtype=jnp.float32)

    # Encoder.
    w0x, b0 = params["enc0"]
    enc_hidden = list(cfg.enc_layer_sizes[1:])
    h = mm(x, w0x[:x_width, :enc_hidden[0]])
    if cfg.conditional:
        h = h + mm(onehot, params["enc0_c"][:cfg.num_labels, :enc_hidden[0]])
    h = jnp.maximum(h + b0[0, :enc_hidden[0]], 0.0)
    for (w, b), (in_d, out_d) in zip(params["enc_rest"],
                                     zip(enc_hidden[:-1], enc_hidden[1:])):
        h = jnp.maximum(mm(h, w[:in_d, :out_d]) + b[0, :out_d], 0.0)

    hid = enc_hidden[-1]
    wh, bh = params["head"]
    means = mm(h, wh[:hid, :latent]) + bh[0, :latent]
    log_var = mm(h, wh[:hid, lat_pad:lat_pad + latent]) + bh[0, lat_pad:lat_pad + latent]
    z = means + eps * jnp.exp(0.5 * log_var)

    # Decoder.
    wd0z, bd0 = params["dec0"]
    dec_sizes = list(cfg.dec_layer_sizes)
    d = mm(z, wd0z[:latent, :dec_sizes[0]])
    if cfg.conditional:
        d = d + mm(onehot, params["dec0_c"][:cfg.num_labels, :dec_sizes[0]])
    d = d + bd0[0, :dec_sizes[0]]
    if len(dec_sizes) > 1:
        d = jnp.maximum(d, 0.0)
        for li, ((w, b), (in_d, out_d)) in enumerate(
                zip(params["dec_rest"], zip(dec_sizes[:-1], dec_sizes[1:]))):
            d = mm(d, w[:in_d, :out_d]) + b[0, :out_d]
            if li + 1 < len(params["dec_rest"]):
                d = jnp.maximum(d, 0.0)
    d = jax.nn.sigmoid(d)
    return d, means, log_var, z


if __name__ == "__main__":
    cfg = VAEConfig(
        enc_layer_sizes=(784, 256),   # forward implies 28*28 input
        latent_size=16,
        dec_layer_sizes=(256, 784),
        conditional=True,
        num_labels=10,                # matches idx2onehot(c, n=10) in the module
    )
    B = 8

    key = jax.random.PRNGKey(0)
    kp, kx, kc, ke = jax.random.split(key, 4)
    params = init_vae_params(kp, cfg)
    x = jax.random.uniform(kx, (B, 1, 28, 28), jnp.float32)
    c = jax.random.randint(kc, (B,), 0, cfg.num_labels, jnp.int32)
    eps = jax.random.normal(ke, (B, cfg.latent_size), jnp.float32)

    recon, means, log_var, z = vae_forward(x, c, eps, params, cfg=cfg)
    recon = jax.block_until_ready(recon)

    r_recon, r_means, r_logvar, r_z = reference_vae(x, c, eps, params, cfg)

    assert recon.shape == (B, cfg.dec_layer_sizes[-1])
    assert means.shape == (B, cfg.latent_size)
    assert jnp.allclose(means, r_means, atol=1e-3, rtol=1e-3)
    assert jnp.allclose(log_var, r_logvar, atol=1e-3, rtol=1e-3)
    assert jnp.allclose(z, r_z, atol=2e-3, rtol=2e-3)
    # recon is stored as bf16 (lane-dense bf16 HBM write) -> looser tolerance.
    assert jnp.allclose(recon.astype(jnp.float32), r_recon, atol=2e-2, rtol=2e-2)

    print("KERNEL_OK")
</pallas_src>

<mosaic_0001>
module attributes {stable_mosaic.version = 11 : i64} {
  func.func @kernel(%arg0: i32, %arg1: memref<16x896xbf16, #tpu.memory_space<vmem>>, %arg2: memref<16x1xi32, #tpu.memory_space<vmem>>, %arg3: memref<16x128xf32, #tpu.memory_space<vmem>>, %arg4: memref<896x256xbf16, #tpu.memory_space<vmem>>, %arg5: memref<1x256xf32, #tpu.memory_space<vmem>>, %arg6: memref<128x256xbf16, #tpu.memory_space<vmem>>, %arg7: memref<256x256xbf16, #tpu.memory_space<vmem>>, %arg8: memref<1x256xf32, #tpu.memory_space<vmem>>, %arg9: memref<128x256xbf16, #tpu.memory_space<vmem>>, %arg10: memref<1x256xf32, #tpu.memory_space<vmem>>, %arg11: memref<128x256xbf16, #tpu.memory_space<vmem>>, %arg12: memref<256x896xbf16, #tpu.memory_space<vmem>>, %arg13: memref<1x896xf32, #tpu.memory_space<vmem>>, %arg14: memref<16x896xbf16, #tpu.memory_space<vmem>>, %arg15: memref<16x384xf32, #tpu.memory_space<vmem>>) attributes {dimension_semantics = [#tpu.dimension_semantics<parallel>], iteration_bounds = array<i64: 1>, scalar_prefetch = 0 : i64, scratch_operands = 0 : i64, tpu.core_type = #tpu.core_type<tc>, window_params = [{transform_indices = @transform_0, window_bounds = array<i64: 16, 896>}, {transform_indices = @transform_1, window_bounds = array<i64: 16, 1>}, {transform_indices = @transform_2, window_bounds = array<i64: 16, 128>}, {pipeline_mode = #tpu.pipeline_mode<synchronous>, transform_indices = @transform_3, window_bounds = array<i64: 896, 256>}, {pipeline_mode = #tpu.pipeline_mode<synchronous>, transform_indices = @transform_4, window_bounds = array<i64: 1, 256>}, {pipeline_mode = #tpu.pipeline_mode<synchronous>, transform_indices = @transform_5, window_bounds = array<i64: 128, 256>}, {pipeline_mode = #tpu.pipeline_mode<synchronous>, transform_indices = @transform_6, window_bounds = array<i64: 256, 256>}, {pipeline_mode = #tpu.pipeline_mode<synchronous>, transform_indices = @transform_7, window_bounds = array<i64: 1, 256>}, {pipeline_mode = #tpu.pipeline_mode<synchronous>, transform_indices = @transform_8, window_bounds = array<i64: 128, 256>}, {pipeline_mode = #tpu.pipeline_mode<synchronous>, transform_indices = @transform_9, window_bounds = array<i64: 1, 256>}, {pipeline_mode = #tpu.pipeline_mode<synchronous>, transform_indices = @transform_10, window_bounds = array<i64: 128, 256>}, {pipeline_mode = #tpu.pipeline_mode<synchronous>, transform_indices = @transform_11, window_bounds = array<i64: 256, 896>}, {pipeline_mode = #tpu.pipeline_mode<synchronous>, transform_indices = @transform_12, window_bounds = array<i64: 1, 896>}, {transform_indices = @transform_13, window_bounds = array<i64: 16, 896>}, {transform_indices = @transform_14, window_bounds = array<i64: 16, 384>}]} {
    %c0 = arith.constant 0 : index
    %c0_0 = arith.constant 0 : index
    %0 = vector.load %arg2[%c0, %c0_0] : memref<16x1xi32, #tpu.memory_space<vmem>>, vector<16x1xi32>
    %1 = tpu.iota {dimensions = array<i32: 1>} : vector<16x128xi32>
    %2 = vector.broadcast %0 : vector<16x1xi32> to vector<16x128xi32>
    %3 = arith.cmpi eq, %1, %2 : vector<16x128xi32>
    %4 = arith.extui %3 : vector<16x128xi1> to vector<16x128xi32>
    %5 = arith.sitofp %4 : vector<16x128xi32> to vector<16x128xf32>
    %6 = arith.truncf %5 : vector<16x128xf32> to vector<16x128xbf16>
    %c0_1 = arith.constant 0 : index
    %c0_2 = arith.constant 0 : index
    %7 = vector.load %arg1[%c0_1, %c0_2] : memref<16x896xbf16, #tpu.memory_space<vmem>>, vector<16x896xbf16>
    %c0_3 = arith.constant 0 : index
    %c0_4 = arith.constant 0 : index
    %8 = vector.load %arg4[%c0_3, %c0_4] : memref<896x256xbf16, #tpu.memory_space<vmem>>, vector<896x256xbf16>
    %cst = arith.constant dense<0.000000e+00> : vector<16x256xf32>
    %9 = tpu.matmul %7, %8, %cst {dimension_numbers = #tpu.dot_dimension_numbers<[1], [0], [0], [1], [0, 0, 1, 1], [], []>} : vector<16x896xbf16>, vector<896x256xbf16>, vector<16x256xf32> -> vector<16x256xf32>
    %c0_5 = arith.constant 0 : index
    %c0_6 = arith.constant 0 : index
    %10 = vector.load %arg6[%c0_5, %c0_6] : memref<128x256xbf16, #tpu.memory_space<vmem>>, vector<128x256xbf16>
    %cst_7 = arith.constant dense<0.000000e+00> : vector<16x256xf32>
    %11 = tpu.matmul %6, %10, %cst_7 {dimension_numbers = #tpu.dot_dimension_numbers<[1], [0], [0], [1], [0, 0, 1, 1], [], []>} : vector<16x128xbf16>, vector<128x256xbf16>, vector<16x256xf32> -> vector<16x256xf32>
    %12 = arith.addf %9, %11 : vector<16x256xf32>
    %c0_8 = arith.constant 0 : index
    %c0_9 = arith.constant 0 : index
    %13 = vector.load %arg5[%c0_8, %c0_9] : memref<1x256xf32, #tpu.memory_space<vmem>>, vector<1x256xf32>
    %14 = vector.broadcast %13 : vector<1x256xf32> to vector<16x256xf32>
    %15 = arith.addf %12, %14 : vector<16x256xf32>
    %cst_10 = arith.constant 0.000000e+00 : f32
    %16 = vector.broadcast %cst_10 : f32 to vector<16x256xf32>
    %17 = arith.maximumf %15, %16 : vector<16x256xf32>
    %18 = arith.truncf %17 : vector<16x256xf32> to vector<16x256xbf16>
    %c0_11 = arith.constant 0 : index
    %c0_12 = arith.constant 0 : index
    %19 = vector.load %arg7[%c0_11, %c0_12] : memref<256x256xbf16, #tpu.memory_space<vmem>>, vector<256x256xbf16>
    %cst_13 = arith.constant dense<0.000000e+00> : vector<16x256xf32>
    %20 = tpu.matmul %18, %19, %cst_13 {dimension_numbers = #tpu.dot_dimension_numbers<[1], [0], [0], [1], [0, 0, 1, 1], [], []>} : vector<16x256xbf16>, vector<256x256xbf16>, vector<16x256xf32> -> vector<16x256xf32>
    %c0_14 = arith.constant 0 : index
    %c0_15 = arith.constant 0 : index
    %21 = vector.load %arg8[%c0_14, %c0_15] : memref<1x256xf32, #tpu.memory_space<vmem>>, vector<1x256xf32>
    %22 = vector.broadcast %21 : vector<1x256xf32> to vector<16x256xf32>
    %23 = arith.addf %20, %22 : vector<16x256xf32>
    %24 = vector.extract_strided_slice %23 {offsets = [0, 0], sizes = [16, 128], strides = [1, 1]} : vector<16x256xf32> to vector<16x128xf32>
    %25 = vector.extract_strided_slice %23 {offsets = [0, 128], sizes = [16, 128], strides = [1, 1]} : vector<16x256xf32> to vector<16x128xf32>
    %c0_16 = arith.constant 0 : index
    %c0_17 = arith.constant 0 : index
    %26 = vector.load %arg3[%c0_16, %c0_17] : memref<16x128xf32, #tpu.memory_space<vmem>>, vector<16x128xf32>
    %cst_18 = arith.constant 5.000000e-01 : f32
    %27 = vector.broadcast %cst_18 : f32 to vector<16x128xf32>
    %28 = arith.mulf %27, %25 : vector<16x128xf32>
    %29 = math.exp %28 : vector<16x128xf32>
    %30 = arith.mulf %26, %29 : vector<16x128xf32>
    %31 = arith.addf %24, %30 : vector<16x128xf32>
    %32 = arith.truncf %31 : vector<16x128xf32> to vector<16x128xbf16>
    %c0_19 = arith.constant 0 : index
    %c0_20 = arith.constant 0 : index
    %33 = vector.load %arg9[%c0_19, %c0_20] : memref<128x256xbf16, #tpu.memory_space<vmem>>, vector<128x256xbf16>
    %cst_21 = arith.constant dense<0.000000e+00> : vector<16x256xf32>
    %34 = tpu.matmul %32, %33, %cst_21 {dimension_numbers = #tpu.dot_dimension_numbers<[1], [0], [0], [1], [0, 0, 1, 1], [], []>} : vector<16x128xbf16>, vector<128x256xbf16>, vector<16x256xf32> -> vector<16x256xf32>
    %c0_22 = arith.constant 0 : index
    %c0_23 = arith.constant 0 : index
    %35 = vector.load %arg11[%c0_22, %c0_23] : memref<128x256xbf16, #tpu.memory_space<vmem>>, vector<128x256xbf16>
    %cst_24 = arith.constant dense<0.000000e+00> : vector<16x256xf32>
    %36 = tpu.matmul %6, %35, %cst_24 {dimension_numbers = #tpu.dot_dimension_numbers<[1], [0], [0], [1], [0, 0, 1, 1], [], []>} : vector<16x128xbf16>, vector<128x256xbf16>, vector<16x256xf32> -> vector<16x256xf32>
    %37 = arith.addf %34, %36 : vector<16x256xf32>
    %c0_25 = arith.constant 0 : index
    %c0_26 = arith.constant 0 : index
    %38 = vector.load %arg10[%c0_25, %c0_26] : memref<1x256xf32, #tpu.memory_space<vmem>>, vector<1x256xf32>
    %39 = vector.broadcast %38 : vector<1x256xf32> to vector<16x256xf32>
    %40 = arith.addf %37, %39 : vector<16x256xf32>
    %cst_27 = arith.constant 0.000000e+00 : f32
    %41 = vector.broadcast %cst_27 : f32 to vector<16x256xf32>
    %42 = arith.maximumf %40, %41 : vector<16x256xf32>
    %43 = arith.truncf %42 : vector<16x256xf32> to vector<16x256xbf16>
    %c0_28 = arith.constant 0 : index
    %c0_29 = arith.constant 0 : index
    %44 = vector.load %arg12[%c0_28, %c0_29] : memref<256x896xbf16, #tpu.memory_space<vmem>>, vector<256x896xbf16>
    %cst_30 = arith.constant dense<0.000000e+00> : vector<16x896xf32>
    %45 = tpu.matmul %43, %44, %cst_30 {dimension_numbers = #tpu.dot_dimension_numbers<[1], [0], [0], [1], [0, 0, 1, 1], [], []>} : vector<16x256xbf16>, vector<256x896xbf16>, vector<16x896xf32> -> vector<16x896xf32>
    %c0_31 = arith.constant 0 : index
    %c0_32 = arith.constant 0 : index
    %46 = vector.load %arg13[%c0_31, %c0_32] : memref<1x896xf32, #tpu.memory_space<vmem>>, vector<1x896xf32>
    %47 = vector.broadcast %46 : vector<1x896xf32> to vector<16x896xf32>
    %48 = arith.addf %45, %47 : vector<16x896xf32>
    %cst_33 = arith.constant 0.000000e+00 : f32
    %49 = vector.broadcast %cst_33 : f32 to vector<16x896xf32>
    %50 = arith.subf %49, %48 : vector<16x896xf32>
    %51 = math.exp %50 : vector<16x896xf32>
    %cst_34 = arith.constant 1.000000e+00 : f32
    %52 = vector.broadcast %cst_34 : f32 to vector<16x896xf32>
    %53 = arith.addf %52, %51 : vector<16x896xf32>
    %cst_35 = arith.constant 1.000000e+00 : f32
    %54 = vector.broadcast %cst_35 : f32 to vector<16x896xf32>
    %55 = arith.divf %54, %53 : vector<16x896xf32>
    %56 = arith.truncf %55 : vector<16x896xf32> to vector<16x896xbf16>
    %c0_36 = arith.constant 0 : index
    %c0_37 = arith.constant 0 : index
    %57 = vector.load %arg14[%c0_36, %c0_37] : memref<16x896xbf16, #tpu.memory_space<vmem>>, vector<16x896xbf16>
    tpu.vector_store %arg14[%c0_36, %c0_37], %56 {strides = array<i32>} : memref<16x896xbf16, #tpu.memory_space<vmem>>, vector<16x896xbf16>,
    %58 = tpu.concatenate %24, %25, %31 in 1 : vector<16x128xf32>, vector<16x128xf32>, vector<16x128xf32> -> vector<16x384xf32>
    %c0_38 = arith.constant 0 : index
    %c0_39 = arith.constant 0 : index
    %59 = vector.load %arg15[%c0_38, %c0_39] : memref<16x384xf32, #tpu.memory_space<vmem>>, vector<16x384xf32>
    tpu.vector_store %arg15[%c0_38, %c0_39], %58 {strides = array<i32>} : memref<16x384xf32, #tpu.memory_space<vmem>>, vector<16x384xf32>,
    return
  }
  func.func @transform_0(%arg0: i32) -> (i32, i32) {
    %c0_i32 = arith.constant 0 : i32
    %c0_i32_0 = arith.constant 0 : i32
    return %arg0, %c0_i32 : i32, i32
  }
  func.func @transform_1(%arg0: i32) -> (i32, i32) {
    %c0_i32 = arith.constant 0 : i32
    %c0_i32_0 = arith.constant 0 : i32
    return %arg0, %c0_i32 : i32, i32
  }
  func.func @transform_2(%arg0: i32) -> (i32, i32) {
    %c0_i32 = arith.constant 0 : i32
    %c0_i32_0 = arith.constant 0 : i32
    return %arg0, %c0_i32 : i32, i32
  }
  func.func @transform_3(%arg0: i32) -> (i32, i32) {
    %c0_i32 = arith.constant 0 : i32
    %c0_i32_0 = arith.constant 0 : i32
    %c0_i32_1 = arith.constant 0 : i32
    return %c0_i32, %c0_i32_0 : i32, i32
  }
  func.func @transform_4(%arg0: i32) -> (i32, i32) {
    %c0_i32 = arith.constant 0 : i32
    %c0_i32_0 = arith.constant 0 : i32
    %c0_i32_1 = arith.constant 0 : i32
    return %c0_i32, %c0_i32_0 : i32, i32
  }
  func.func @transform_5(%arg0: i32) -> (i32, i32) {
    %c0_i32 = arith.constant 0 : i32
    %c0_i32_0 = arith.constant 0 : i32
    %c0_i32_1 = arith.constant 0 : i32
    return %c0_i32, %c0_i32_0 : i32, i32
  }
  func.func @transform_6(%arg0: i32) -> (i32, i32) {
    %c0_i32 = arith.constant 0 : i32
    %c0_i32_0 = arith.constant 0 : i32
    %c0_i32_1 = arith.constant 0 : i32
    return %c0_i32, %c0_i32_0 : i32, i32
  }
  func.func @transform_7(%arg0: i32) -> (i32, i32) {
    %c0_i32 = arith.constant 0 : i32
    %c0_i32_0 = arith.constant 0 : i32
    %c0_i32_1 = arith.constant 0 : i32
    return %c0_i32, %c0_i32_0 : i32, i32
  }
  func.func @transform_8(%arg0: i32) -> (i32, i32) {
    %c0_i32 = arith.constant 0 : i32
    %c0_i32_0 = arith.constant 0 : i32
    %c0_i32_1 = arith.constant 0 : i32
    return %c0_i32, %c0_i32_0 : i32, i32
  }
  func.func @transform_9(%arg0: i32) -> (i32, i32) {
    %c0_i32 = arith.constant 0 : i32
    %c0_i32_0 = arith.constant 0 : i32
    %c0_i32_1 = arith.constant 0 : i32
    return %c0_i32, %c0_i32_0 : i32, i32
  }
  func.func @transform_10(%arg0: i32) -> (i32, i32) {
    %c0_i32 = arith.constant 0 : i32
    %c0_i32_0 = arith.constant 0 : i32
    %c0_i32_1 = arith.constant 0 : i32
    return %c0_i32, %c0_i32_0 : i32, i32
  }
  func.func @transform_11(%arg0: i32) -> (i32, i32) {
    %c0_i32 = arith.constant 0 : i32
    %c0_i32_0 = arith.constant 0 : i32
    %c0_i32_1 = arith.constant 0 : i32
    return %c0_i32, %c0_i32_0 : i32, i32
  }
  func.func @transform_12(%arg0: i32) -> (i32, i32) {
    %c0_i32 = arith.constant 0 : i32
    %c0_i32_0 = arith.constant 0 : i32
    %c0_i32_1 = arith.constant 0 : i32
    return %c0_i32, %c0_i32_0 : i32, i32
  }
  func.func @transform_13(%arg0: i32) -> (i32, i32) {
    %c0_i32 = arith.constant 0 : i32
    %c0_i32_0 = arith.constant 0 : i32
    return %arg0, %c0_i32 : i32, i32
  }
  func.func @transform_14(%arg0: i32) -> (i32, i32) {
    %c0_i32 = arith.constant 0 : i32
    %c0_i32_0 = arith.constant 0 : i32
    return %arg0, %c0_i32 : i32, i32
  }
}

</mosaic_0001>

<bundles_post_ra>
// kernel: vae_forward.1
= control target key start
LH: loop header
LB: loop body
LE: loop exit
PB: predicated region body
PF: predicated region fallthrough
CT: control target
= control target key end

     0   :  { %20 = vsyncpa [#allocation3], 0  ;;  %s4207_s0 = inlined_call_operand.vmem [shape: bf16[16,896], index: 0, kind: input, shape index: {}]   ;;  %s4208_s1 = inlined_call_operand.vmem [shape: s32[16,1], index: 1, kind: input, shape index: {}]   ;;  %s4209_s2 = inlined_call_operand.vmem [shape: f32[16,128], index: 2, kind: input, shape index: {}]   ;;  %s4210_s3 = inlined_call_operand.hbm [shape: bf16[896,256], index: 3, kind: input, shape index: {}]   ;;  %s4211_s4 = inlined_call_operand.vmem [shape: f32[1,256], index: 4, kind: input, shape index: {}]   ;;  %s4212_s5 = inlined_call_operand.vmem [shape: bf16[128,256], index: 5, kind: input, shape index: {}]   ;;  %s4213_s6 = inlined_call_operand.vmem [shape: bf16[256,256], index: 6, kind: input, shape index: {}]   ;;  %s4214_s7 = inlined_call_operand.vmem [shape: f32[1,256], index: 7, kind: input, shape index: {}]   ;;  %s4215_s8 = inlined_call_operand.vmem [shape: bf16[128,256], index: 8, kind: input, shape index: {}]   ;;  %s4216_s9 = inlined_call_operand.vmem [shape: f32[1,256], index: 9, kind: input, shape index: {}]   ;;  %s4217_s10 = inlined_call_operand.vmem [shape: bf16[128,256], index: 10, kind: input, shape index: {}]   ;;  %s4218_s11 = inlined_call_operand.hbm [shape: bf16[256,896], index: 11, kind: input, shape index: {}]   ;;  %s4219_s12 = inlined_call_operand.vmem [shape: f32[1,896], index: 12, kind: input, shape index: {}]   ;;  %s4220_s13 = inlined_call_operand.vmem [shape: bf16[16,896], index: 13, kind: output, shape index: {0}]   ;;  %s4221_s14 = inlined_call_operand.vmem [shape: f32[16,384], index: 14, kind: output, shape index: {1}]  }
   0x1   :  { %21 = vsyncpa [#allocation5], 0  ;;  %s3714_s29 = smov [#allocation2]   ;;  %s3666_s17 = scalar_lea.hbm %s4210_s3, 14336 }
   0x2   :  { %s33_s30 = sshll.u32 %s3714_s29, 4  ;;  %p3667_p0 = scmp.ne.s32.totalorder %s4210_s3, %s3666_s17  ;;  %s34_s30 = int_to_ptr.vmem [resolvable:$true] %s33_s30 }
   0x3   :  { %p3670_p1 = scmp.lt.u32.totalorder %s3666_s17, %s4210_s3 }
   0x5   :  { %p3672_p2 = pnand %p3670_p1, %p3667_p0 }
   0x7   :  { %3675 = shalt.err (!%p3672_p2)
}
   0x8   :  { %s3676_s22 = scalar_lea.vmem %s34_s30, 14336  ;;  %p3681_p4 = scmp.lt.s32.totalorder %s34_s30, %s34_s30 }
   0x9   :  { %p3677_p3 = scmp.ne.s32.totalorder %s34_s30, %s3676_s22  ;;  %p3682_p5 = scmp.lt.s32.totalorder %s3676_s22, %s3676_s22 }
   0xb   :  { %p3683_p6 = por %p3682_p5, %p3681_p4 }
   0xd   :  { %p3684_p7 = pnand %p3683_p6, %p3677_p3 }
   0xf   :  { %3687 = shalt.err (!%p3684_p7)
}
  0x10   :  { %s3715_s23 = smov 128   ;;  %s3716_s24 = smov 8  }
  0x11   :  { %39 = dma.hbm_to_vmem [thread:$0]  %s4210_s3, 14336, %s34_s30, [#allocation3], %s3715_s23, %s3715_s23, %s3716_s24  }
  0x12   :  { %s3717_s27 = smov [#allocation4]   ;;  %s3688_s16 = scalar_lea.hbm %s4218_s11, 14336 }
  0x13   :  { %s59_s28 = sshll.u32 %s3717_s27, 4  ;;  %p3689_p8 = scmp.ne.s32.totalorder %s4218_s11, %s3688_s16  ;;  %s60_s28 = int_to_ptr.vmem [resolvable:$true] %s59_s28 }
  0x14   :  { %p3692_p9 = scmp.lt.u32.totalorder %s3688_s16, %s4218_s11 }
  0x16   :  { %p3694_p10 = pnand %p3692_p9, %p3689_p8 }
  0x18   :  { %3697 = shalt.err (!%p3694_p10)
}
  0x19   :  { %s3698_s21 = scalar_lea.vmem %s60_s28, 14336  ;;  %p3703_p12 = scmp.lt.s32.totalorder %s60_s28, %s60_s28 }
  0x1a   :  { %p3699_p11 = scmp.ne.s32.totalorder %s60_s28, %s3698_s21  ;;  %p3704_p13 = scmp.lt.s32.totalorder %s3698_s21, %s3698_s21 }
  0x1c   :  { %p3705_p0 = por %p3704_p13, %p3703_p12 }
  0x1e   :  { %p3706_p1 = pnand %p3705_p0, %p3699_p11 }
  0x20   :  { %3709 = shalt.err (!%p3706_p1)
}
  0x21   :  { %s3718_s3 = smov 448   ;;  %s3719_s30 = smov 28  }
  0x22   :  { %65 = dma.hbm_to_vmem [thread:$0]  %s4218_s11, 14336, %s60_s28, [#allocation5], %s3718_s3, %s3718_s3, %s3719_s30  }
  0x23   :  { %3710 = dma.done.wait [#allocation3], 14336  }
  0x24   :  { %3711 = vsyncadd [#allocation3], 4294952960 }
  0x25   :  { %3712 = dma.done.wait [#allocation5], 14336  }
  0x26   :  { %3713 = vsyncadd [#allocation5], 4294952960  ;;  %v3720_v0 = vmov 0   ;;  %v75_v1 = vld [vmem:[%s4208_s1] sm:$0xff]  ;;  %v76_v2 = vld [vmem:[%s4208_s1 + $0x8] sm:$0xff]  ;;  %v77_v20 = vlaneseq }
  0x27   :  { %3147 = vset.pattern.permute.xlu0 %v3720_v0  ;;  %340 = vmatprep.mubr.bf16.mxu0 %v3720_v0  ;;  %v3148_v3 = vld [vmem:[%s4212_s5 + $0x4] ss:$8 sps:$4 sm:$0xff]   ;;  %v3150_v4 = vld [vmem:[%s4212_s5] ss:$8 sps:$4 sm:$0xff]   ;;  %v3151_v5 = vld [vmem:[%s4212_s5 + $0x14] ss:$8 sps:$4 sm:$0xff]  }
  0x28   :  { %80 = vperm.xlu0 %3147, %v75_v1   ;;  %308 = vmatprep.subr.bf16.mxu0 %v3148_v3  ;;  %v3153_v6 = vld [vmem:[%s4212_s5 + $0x10] ss:$8 sps:$4 sm:$0xff]   ;;  %v3154_v7 = vld [vmem:[%s4212_s5 + $0x24] ss:$8 sps:$4 sm:$0xff]   ;;  %v3156_v8 = vld [vmem:[%s4212_s5 + $0x20] ss:$8 sps:$4 sm:$0xff]  }
  0x29   :  { %309 = vmatpush1.bf16.msra.mxu0 %v3150_v4  ;;  %v3157_v9 = vld [vmem:[%s4212_s5 + $0x34] ss:$8 sps:$4 sm:$0xff]   ;;  %v3159_v10 = vld [vmem:[%s4212_s5 + $0x30] ss:$8 sps:$4 sm:$0xff]   ;;  %v3160_v11 = vld [vmem:[%s4212_s5 + $0x44] ss:$8 sps:$4 sm:$0xff]  }
  0x2a   :  { %310 = vmatprep.subr.bf16.mxu0 %v3151_v5  ;;  %v3162_v12 = vld [vmem:[%s4212_s5 + $0x40] ss:$8 sps:$4 sm:$0xff]   ;;  %v3163_v13 = vld [vmem:[%s4212_s5 + $0x54] ss:$8 sps:$4 sm:$0xff]   ;;  %v3165_v14 = vld [vmem:[%s4212_s5 + $0x50] ss:$8 sps:$4 sm:$0xff]  }
  0x2b   :  { %v3166_v15 = vld [vmem:[%s4212_s5 + $0x64] ss:$8 sps:$4 sm:$0xff]   ;;  %v3168_v16 = vld [vmem:[%s4212_s5 + $0x60] ss:$8 sps:$4 sm:$0xff]   ;;  %v3169_v17 = vld [vmem:[%s4212_s5 + $0x74] ss:$8 sps:$4 sm:$0xff]  }
  0x2c   :  { %83 = vperm.xlu0 %3147, %v76_v2   ;;  %v3171_v18 = vld [vmem:[%s4212_s5 + $0x70] ss:$8 sps:$4 sm:$0xff]   ;;  %v3174_v19 = vld [vmem:[#allocation2 + $0x4] ss:$8 sps:$4 sm:$0xff]   ;;  %v78_v21 = vand.u32 127, %v77_v20 }
  0x2d   :  { %311 = vmatpush1.bf16.msra.mxu0 %v3153_v6  ;;  %v3172_v24 = vld [vmem:[#allocation2] ss:$8 sps:$4 sm:$0xff]   ;;  %v3177_v26 = vld [vmem:[#allocation2 + $0x14] ss:$8 sps:$4 sm:$0xff]   ;;  %v3721_v28 = vmov 1.0|1.0  }
  0x2e   :  { %312 = vmatprep.subr.bf16.mxu0 %v3154_v7  ;;  %v3222_v25 = vld [vmem:[%s4207_s0 + $0x4] ss:$28 sps:$4 sm:$0xff]   ;;  %v3175_v29 = vld [vmem:[#allocation2 + $0x10] ss:$8 sps:$4 sm:$0xff]   ;;  %v3183_v32 = vld [vmem:[#allocation2 + $0x34] ss:$8 sps:$4 sm:$0xff]  }
  0x2f   :  { %v3180_v30 = vld [vmem:[#allocation2 + $0x24] ss:$8 sps:$4 sm:$0xff]   ;;  %v3178_v31 = vld [vmem:[#allocation2 + $0x20] ss:$8 sps:$4 sm:$0xff]   ;;  %v3181_v33 = vld [vmem:[#allocation2 + $0x30] ss:$8 sps:$4 sm:$0xff]  }
  0x30   :  { %v3186_v34 = vld [vmem:[#allocation2 + $0x44] ss:$8 sps:$4 sm:$0xff]   ;;  %v3184_v35 = vld [vmem:[#allocation2 + $0x40] ss:$8 sps:$4 sm:$0xff]   ;;  %v3189_v36 = vld [vmem:[#allocation2 + $0x54] ss:$8 sps:$4 sm:$0xff]  }
  0x31   :  { %313 = vmatpush1.bf16.msra.mxu0 %v3156_v8  ;;  %v3187_v37 = vld [vmem:[#allocation2 + $0x50] ss:$8 sps:$4 sm:$0xff]   ;;  %v3192_v38 = vld [vmem:[#allocation2 + $0x64] ss:$8 sps:$4 sm:$0xff]   ;;  %v3190_v39 = vld [vmem:[#allocation2 + $0x60] ss:$8 sps:$4 sm:$0xff]  }
  0x32   :  { %314 = vmatprep.subr.bf16.mxu0 %v3157_v9  ;;  %v3195_v40 = vld [vmem:[#allocation2 + $0x74] ss:$8 sps:$4 sm:$0xff]   ;;  %v3193_v41 = vld [vmem:[#allocation2 + $0x70] ss:$8 sps:$4 sm:$0xff]   ;;  %v3198_v42 = vld [vmem:[#allocation2 + $0x84] ss:$8 sps:$4 sm:$0xff]  }
  0x33   :  { %v3196_v43 = vld [vmem:[#allocation2 + $0x80] ss:$8 sps:$4 sm:$0xff]   ;;  %v3201_v44 = vld [vmem:[#allocation2 + $0x94] ss:$8 sps:$4 sm:$0xff]   ;;  %v3199_v45 = vld [vmem:[#allocation2 + $0x90] ss:$8 sps:$4 sm:$0xff]  }
  0x34   :  { %v3204_v46 = vld [vmem:[#allocation2 + $0xa4] ss:$8 sps:$4 sm:$0xff]   ;;  %v3202_v47 = vld [vmem:[#allocation2 + $0xa0] ss:$8 sps:$4 sm:$0xff]   ;;  %v3207_v48 = vld [vmem:[#allocation2 + $0xb4] ss:$8 sps:$4 sm:$0xff]  }
  0x35   :  { %315 = vmatpush1.bf16.msra.mxu0 %v3159_v10  ;;  %v3205_v49 = vld [vmem:[#allocation2 + $0xb0] ss:$8 sps:$4 sm:$0xff]   ;;  %v3210_v50 = vld [vmem:[#allocation2 + $0xc4] ss:$8 sps:$4 sm:$0xff]   ;;  %v3208_v51 = vld [vmem:[#allocation2 + $0xc0] ss:$8 sps:$4 sm:$0xff]  }
  0x36   :  { %316 = vmatprep.subr.bf16.mxu0 %v3160_v11  ;;  %v3213_v52 = vld [vmem:[#allocation2 + $0xd4] ss:$8 sps:$4 sm:$0xff]   ;;  %v3211_v53 = vld [vmem:[#allocation2 + $0xd0] ss:$8 sps:$4 sm:$0xff]   ;;  %v3216_v54 = vld [vmem:[#allocation2 + $0xe4] ss:$8 sps:$4 sm:$0xff]  }
  0x37   :  { %v3214_v55 = vld [vmem:[#allocation2 + $0xe0] ss:$8 sps:$4 sm:$0xff]   ;;  %v3219_v56 = vld [vmem:[#allocation2 + $0xf4] ss:$8 sps:$4 sm:$0xff]   ;;  %v3217_v57 = vld [vmem:[#allocation2 + $0xf0] ss:$8 sps:$4 sm:$0xff]  }
  0x38   :  { %v3225_v58 = vld [vmem:[#allocation2 + $0x104] ss:$8 sps:$4 sm:$0xff]   ;;  %v3220_v59 = vld [vmem:[%s4207_s0] ss:$28 sps:$4 sm:$0xff]   ;;  %v3226_v63 = vld [vmem:[#allocation2 + $0x110] ss:$8 sps:$4 sm:$0xff]  }
  0x39   :  { %317 = vmatpush1.bf16.msra.mxu0 %v3162_v12  ;;  %v3223_v60 = vld [vmem:[#allocation2 + $0x100] ss:$8 sps:$4 sm:$0xff]   ;;  %v3228_v62 = vld [vmem:[#allocation2 + $0x114] ss:$8 sps:$4 sm:$0xff]   ;;  %v3231_v1 = vld [vmem:[#allocation2 + $0x124] ss:$8 sps:$4 sm:$0xff]  }
  0x3a   :  { %318 = vmatprep.subr.bf16.mxu0 %v3163_v13  ;;  %v3273_v61 = vld [vmem:[%s4207_s0 + $0xc] ss:$28 sps:$4 sm:$0xff]   ;;  %v3234_v3 = vld [vmem:[#allocation2 + $0x134] ss:$8 sps:$4 sm:$0xff]   ;;  %v3232_v4 = vld [vmem:[#allocation2 + $0x130] ss:$8 sps:$4 sm:$0xff]  }
  0x3b   :  { %v3229_v2 = vld [vmem:[#allocation2 + $0x120] ss:$8 sps:$4 sm:$0xff]   ;;  %v3237_v5 = vld [vmem:[#allocation2 + $0x144] ss:$8 sps:$4 sm:$0xff]   ;;  %v3240_v7 = vld [vmem:[#allocation2 + $0x154] ss:$8 sps:$4 sm:$0xff]  }
  0x3c   :  { %v3235_v6 = vld [vmem:[#allocation2 + $0x140] ss:$8 sps:$4 sm:$0xff]   ;;  %v3238_v8 = vld [vmem:[#allocation2 + $0x150] ss:$8 sps:$4 sm:$0xff]   ;;  %v3243_v9 = vld [vmem:[#allocation2 + $0x164] ss:$8 sps:$4 sm:$0xff]  }
  0x3d   :  { %319 = vmatpush1.bf16.msra.mxu0 %v3165_v14  ;;  %v3241_v10 = vld [vmem:[#allocation2 + $0x160] ss:$8 sps:$4 sm:$0xff]   ;;  %v3246_v11 = vld [vmem:[#allocation2 + $0x174] ss:$8 sps:$4 sm:$0xff]   ;;  %v3244_v12 = vld [vmem:[#allocation2 + $0x170] ss:$8 sps:$4 sm:$0xff]  }
  0x3e   :  { %320 = vmatprep.subr.bf16.mxu0 %v3166_v15  ;;  %v3249_v13 = vld [vmem:[#allocation2 + $0x184] ss:$8 sps:$4 sm:$0xff]   ;;  %v3247_v14 = vld [vmem:[#allocation2 + $0x180] ss:$8 sps:$4 sm:$0xff]   ;;  %v3252_v15 = vld [vmem:[#allocation2 + $0x194] ss:$8 sps:$4 sm:$0xff]  }
  0x3f   :  { %v3433_v27 = vld [vmem:[%s4215_s8 + $0x34] ss:$8 sps:$4 sm:$0xff]  }
  0x41   :  { %321 = vmatpush1.bf16.msra.mxu0 %v3168_v16  ;;  %v3350_v16 = vld [vmem:[%s4213_s6 + $0x4] ss:$8 sps:$4 sm:$0xff]  }
  0x42   :  { %322 = vmatprep.subr.bf16.mxu0 %v3169_v17  ;;  %v3352_v17 = vld [vmem:[%s4213_s6] ss:$8 sps:$4 sm:$0xff]   ;;  %1345 = vmatprep.subr.bf16.mxu1 %v3350_v16 }
  0x43   :  { %1346 = vmatpush1.bf16.msra.mxu1 %v3352_v17  ;;  %v3298_v16 = vld [vmem:[#allocation2 + $0x280] ss:$8 sps:$4 sm:$0xff]   ;;  %v3303_v17 = vld [vmem:[#allocation2 + $0x294] ss:$8 sps:$4 sm:$0xff]  }
  0x45   :  { %323 = vmatpush1.bf16.msra.mxu0 %v3171_v18  ;;  %v3353_v18 = vld [vmem:[%s4213_s6 + $0x14] ss:$8 sps:$4 sm:$0xff]  }
  0x46   :  { %947 = vmatprep.subr.bf16.mxu0 %v3174_v19  ;;  %v3250_v19 = vld [vmem:[#allocation2 + $0x190] ss:$8 sps:$4 sm:$0xff]   ;;  %1347 = vmatprep.subr.bf16.mxu1 %v3353_v18 }
  0x47   :  { %v3301_v18 = vld [vmem:[#allocation2 + $0x290] ss:$8 sps:$4 sm:$0xff]  }
  0xa7   :  { %v81_v22 = vpop.permute.xlu0 %80 }
  0xa8   :  { %vm85_vm0 = vcmp.eq.s32.totalorder %v78_v21, %v81_v22  ;;  %v3355_v22 = vld [vmem:[%s4213_s6 + $0x10] ss:$8 sps:$4 sm:$0xff]  }
  0xa9   :  { %1348 = vmatpush1.bf16.msra.mxu1 %v3355_v22  ;;  %v3309_v22 = vld [vmem:[#allocation2 + $0x2b4] ss:$8 sps:$4 sm:$0xff]  }
  0xab   :  { %v84_v23 = vpop.permute.xlu0 %83 }
  0xac   :  { %vm86_vm1 = vcmp.eq.s32.totalorder %v78_v21, %v84_v23  ;;  %v3255_v21 = vld [vmem:[#allocation2 + $0x1a4] ss:$8 sps:$4 sm:$0xff]  }
  0xad   :  { %vm3881_vm2 = vmpackc.low %vm86_vm1, %vm85_vm0  ;;  %v3356_v23 = vld [vmem:[%s4213_s6 + $0x24] ss:$8 sps:$4 sm:$0xff]  }
  0xae   :  { %2783 = vmatmul.mubr.msk.bf16.vlgmr.msra.gmra.mrb[0].mxu0 %vm3881_vm2, %v3721_v28  ;;  %1349 = vmatprep.subr.bf16.mxu1 %v3356_v23  ;;  %v3307_v23 = vld [vmem:[#allocation2 + $0x2b0] ss:$8 sps:$4 sm:$0xff]  }
  0xaf   :  { %948 = vmatpush1.bf16.msra.mxu0 %v3172_v24  ;;  %979 = vmatprep.mubr.bf16.mxu0 %v3222_v25  ;;  %v3253_v24 = vld [vmem:[#allocation2 + $0x1a0] ss:$8 sps:$4 sm:$0xff]   ;;  %v3258_v25 = vld [vmem:[#allocation2 + $0x1b4] ss:$8 sps:$4 sm:$0xff]  }
  0xb0   :  { %949 = vmatprep.subr.bf16.mxu0 %v3177_v26  ;;  %v3358_v26 = vld [vmem:[%s4213_s6 + $0x20] ss:$8 sps:$4 sm:$0xff]  }
  0xb1   :  { %1350 = vmatpush1.bf16.msra.mxu1 %v3358_v26  ;;  %v3315_v26 = vld [vmem:[#allocation2 + $0x2d4] ss:$8 sps:$4 sm:$0xff]  }
  0xb3   :  { %950 = vmatpush1.bf16.msra.mxu0 %v3175_v29  ;;  %v3359_v29 = vld [vmem:[%s4213_s6 + $0x34] ss:$8 sps:$4 sm:$0xff]  }
  0xb4   :  { %951 = vmatprep.subr.bf16.mxu0 %v3180_v30  ;;  %v3256_v30 = vld [vmem:[#allocation2 + $0x1b0] ss:$8 sps:$4 sm:$0xff]   ;;  %1351 = vmatprep.subr.bf16.mxu1 %v3359_v29 }
  0xb5   :  { %v3313_v29 = vld [vmem:[#allocation2 + $0x2d0] ss:$8 sps:$4 sm:$0xff]  }
  0xb7   :  { %952 = vmatpush1.bf16.msra.mxu0 %v3178_v31  ;;  %v3261_v31 = vld [vmem:[#allocation2 + $0x1c4] ss:$8 sps:$4 sm:$0xff]  }
  0xb8   :  { %953 = vmatprep.subr.bf16.mxu0 %v3183_v32  ;;  %v3361_v32 = vld [vmem:[%s4213_s6 + $0x30] ss:$8 sps:$4 sm:$0xff]  }
  0xb9   :  { %1352 = vmatpush1.bf16.msra.mxu1 %v3361_v32  ;;  %v3321_v32 = vld [vmem:[#allocation2 + $0x2f4] ss:$8 sps:$4 sm:$0xff]  }
  0xbb   :  { %954 = vmatpush1.bf16.msra.mxu0 %v3181_v33  ;;  %v3362_v33 = vld [vmem:[%s4213_s6 + $0x44] ss:$8 sps:$4 sm:$0xff]  }
  0xbc   :  { %955 = vmatprep.subr.bf16.mxu0 %v3186_v34  ;;  %v3259_v34 = vld [vmem:[#allocation2 + $0x1c0] ss:$8 sps:$4 sm:$0xff]   ;;  %1353 = vmatprep.subr.bf16.mxu1 %v3362_v33  ;;  %v3319_v33 = vld [vmem:[#allocation2 + $0x2f0] ss:$8 sps:$4 sm:$0xff]  }
  0xbf   :  { %956 = vmatpush1.bf16.msra.mxu0 %v3184_v35  ;;  %v3264_v35 = vld [vmem:[#allocation2 + $0x1d4] ss:$8 sps:$4 sm:$0xff]  }
  0xc0   :  { %957 = vmatprep.subr.bf16.mxu0 %v3189_v36  ;;  %v3364_v36 = vld [vmem:[%s4213_s6 + $0x40] ss:$8 sps:$4 sm:$0xff]  }
  0xc1   :  { %1354 = vmatpush1.bf16.msra.mxu1 %v3364_v36  ;;  %v3325_v36 = vld [vmem:[#allocation2 + $0x300] ss:$8 sps:$4 sm:$0xff]  }
  0xc3   :  { %958 = vmatpush1.bf16.msra.mxu0 %v3187_v37  ;;  %v3365_v37 = vld [vmem:[%s4213_s6 + $0x54] ss:$8 sps:$4 sm:$0xff]  }
  0xc4   :  { %959 = vmatprep.subr.bf16.mxu0 %v3192_v38  ;;  %v3262_v38 = vld [vmem:[#allocation2 + $0x1d0] ss:$8 sps:$4 sm:$0xff]   ;;  %1355 = vmatprep.subr.bf16.mxu1 %v3365_v37  ;;  %v3330_v37 = vld [vmem:[#allocation2 + $0x314] ss:$8 sps:$4 sm:$0xff]  }
  0xc7   :  { %960 = vmatpush1.bf16.msra.mxu0 %v3190_v39  ;;  %v3267_v39 = vld [vmem:[#allocation2 + $0x1e4] ss:$8 sps:$4 sm:$0xff]  }
  0xc8   :  { %961 = vmatprep.subr.bf16.mxu0 %v3195_v40  ;;  %v3367_v40 = vld [vmem:[%s4213_s6 + $0x50] ss:$8 sps:$4 sm:$0xff]  }
  0xc9   :  { %1356 = vmatpush1.bf16.msra.mxu1 %v3367_v40  ;;  %v3331_v40 = vld [vmem:[#allocation2 + $0x320] ss:$8 sps:$4 sm:$0xff]  }
  0xcb   :  { %962 = vmatpush1.bf16.msra.mxu0 %v3193_v41  ;;  %v3368_v41 = vld [vmem:[%s4213_s6 + $0x64] ss:$8 sps:$4 sm:$0xff]  }
  0xcc   :  { %963 = vmatprep.subr.bf16.mxu0 %v3198_v42  ;;  %v3265_v42 = vld [vmem:[#allocation2 + $0x1e0] ss:$8 sps:$4 sm:$0xff]   ;;  %1357 = vmatprep.subr.bf16.mxu1 %v3368_v41  ;;  %v3336_v41 = vld [vmem:[#allocation2 + $0x334] ss:$8 sps:$4 sm:$0xff]  }
  0xcf   :  { %964 = vmatpush1.bf16.msra.mxu0 %v3196_v43  ;;  %v3270_v43 = vld [vmem:[#allocation2 + $0x1f4] ss:$8 sps:$4 sm:$0xff]  }
  0xd0   :  { %965 = vmatprep.subr.bf16.mxu0 %v3201_v44  ;;  %v3370_v44 = vld [vmem:[%s4213_s6 + $0x60] ss:$8 sps:$4 sm:$0xff]  }
  0xd1   :  { %1358 = vmatpush1.bf16.msra.mxu1 %v3370_v44  ;;  %v3337_v44 = vld [vmem:[#allocation2 + $0x340] ss:$8 sps:$4 sm:$0xff]  }
  0xd3   :  { %966 = vmatpush1.bf16.msra.mxu0 %v3199_v45  ;;  %v3371_v45 = vld [vmem:[%s4213_s6 + $0x74] ss:$8 sps:$4 sm:$0xff]  }
  0xd4   :  { %967 = vmatprep.subr.bf16.mxu0 %v3204_v46  ;;  %v3268_v46 = vld [vmem:[#allocation2 + $0x1f0] ss:$8 sps:$4 sm:$0xff]   ;;  %1359 = vmatprep.subr.bf16.mxu1 %v3371_v45  ;;  %v3342_v45 = vld [vmem:[#allocation2 + $0x354] ss:$8 sps:$4 sm:$0xff]  }
  0xd7   :  { %968 = vmatpush1.bf16.msra.mxu0 %v3202_v47  ;;  %v3276_v47 = vld [vmem:[#allocation2 + $0x204] ss:$8 sps:$4 sm:$0xff]  }
  0xd8   :  { %969 = vmatprep.subr.bf16.mxu0 %v3207_v48  ;;  %v3373_v48 = vld [vmem:[%s4213_s6 + $0x70] ss:$8 sps:$4 sm:$0xff]  }
  0xd9   :  { %1360 = vmatpush1.bf16.msra.mxu1 %v3373_v48  ;;  %v3343_v48 = vld [vmem:[#allocation2 + $0x360] ss:$8 sps:$4 sm:$0xff]  }
  0xdb   :  { %970 = vmatpush1.bf16.msra.mxu0 %v3205_v49  ;;  %v3271_v49 = vld [vmem:[%s4207_s0 + $0x8] ss:$28 sps:$4 sm:$0xff]  }
  0xdc   :  { %971 = vmatprep.subr.bf16.mxu0 %v3210_v50  ;;  %v3374_v50 = vld [vmem:[%s4213_s6 + $0x84] ss:$8 sps:$4 sm:$0xff]  }
  0xdd   :  { %1361 = vmatprep.subr.bf16.mxu1 %v3374_v50  ;;  %v3346_v50 = vld [vmem:[#allocation2 + $0x370] ss:$8 sps:$4 sm:$0xff]  }
  0xdf   :  { %972 = vmatpush1.bf16.msra.mxu0 %v3208_v51  ;;  %v3274_v51 = vld [vmem:[#allocation2 + $0x200] ss:$8 sps:$4 sm:$0xff]  }
  0xe0   :  { %973 = vmatprep.subr.bf16.mxu0 %v3213_v52  ;;  %v3324_v52 = vld [vmem:[%s4207_s0 + $0x14] ss:$28 sps:$4 sm:$0xff]  }
  0xe3   :  { %974 = vmatpush1.bf16.msra.mxu0 %v3211_v53  ;;  %v3279_v53 = vld [vmem:[#allocation2 + $0x214] ss:$8 sps:$4 sm:$0xff]  }
  0xe4   :  { %975 = vmatprep.subr.bf16.mxu0 %v3216_v54  ;;  %v3376_v54 = vld [vmem:[%s4213_s6 + $0x80] ss:$8 sps:$4 sm:$0xff]  }
  0xe5   :  { %1362 = vmatpush1.bf16.msra.mxu1 %v3376_v54  ;;  %v3395_v54 = vld [vmem:[%s4213_s6 + $0xf4] ss:$8 sps:$4 sm:$0xff]  }
  0xe7   :  { %976 = vmatpush1.bf16.msra.mxu0 %v3214_v55  ;;  %v3377_v55 = vld [vmem:[%s4213_s6 + $0x94] ss:$8 sps:$4 sm:$0xff]  }
  0xe8   :  { %977 = vmatprep.subr.bf16.mxu0 %v3219_v56  ;;  %v3277_v56 = vld [vmem:[#allocation2 + $0x210] ss:$8 sps:$4 sm:$0xff]   ;;  %1363 = vmatprep.subr.bf16.mxu1 %v3377_v55 }
  0xe9   :  { %v3397_v55 = vld [vmem:[%s4213_s6 + $0xf0] ss:$8 sps:$4 sm:$0xff]  }
  0xeb   :  { %978 = vmatpush1.bf16.msra.mxu0 %v3217_v57  ;;  %v3282_v57 = vld [vmem:[#allocation2 + $0x224] ss:$8 sps:$4 sm:$0xff]  }
  0xec   :  { %990 = vmatprep.subr.bf16.mxu0 %v3225_v58  ;;  %v3379_v58 = vld [vmem:[%s4213_s6 + $0x90] ss:$8 sps:$4 sm:$0xff]  }
  0xed   :  { %1364 = vmatpush1.bf16.msra.mxu1 %v3379_v58 }
  0xee   :  { %980 = vmatmul.mubr.bf16.vlgmr.msra.gmra.mrb[0].mxu0 %v3220_v59  ;;  %v3380_v59 = vld [vmem:[%s4213_s6 + $0xa4] ss:$8 sps:$4 sm:$0xff]  }
  0xef   :  { %991 = vmatpush1.bf16.msra.mxu0 %v3223_v60  ;;  %1022 = vmatprep.mubr.bf16.mxu0 %v3273_v61  ;;  %v3280_v60 = vld [vmem:[#allocation2 + $0x220] ss:$8 sps:$4 sm:$0xff]   ;;  %v3285_v61 = vld [vmem:[#allocation2 + $0x234] ss:$8 sps:$4 sm:$0xff]  }
  0xf0   :  { %992 = vmatprep.subr.bf16.mxu0 %v3228_v62  ;;  %v3382_v62 = vld [vmem:[%s4213_s6 + $0xa0] ss:$8 sps:$4 sm:$0xff]   ;;  %1365 = vmatprep.subr.bf16.mxu1 %v3380_v59 }
  0xf1   :  { %1366 = vmatpush1.bf16.msra.mxu1 %v3382_v62  ;;  %v1119_v59 = vld [vmem:[%s4211_s4] sm:$0x3] }
  0xf3   :  { %993 = vmatpush1.bf16.msra.mxu0 %v3226_v63  ;;  %v3383_v63 = vld [vmem:[%s4213_s6 + $0xb4] ss:$8 sps:$4 sm:$0xff]  }
  0xf4   :  { %994 = vmatprep.subr.bf16.mxu0 %v3231_v1  ;;  %v3283_v1 = vld [vmem:[#allocation2 + $0x230] ss:$8 sps:$4 sm:$0xff]   ;;  %1367 = vmatprep.subr.bf16.mxu1 %v3383_v63 }
  0xf7   :  { %995 = vmatpush1.bf16.msra.mxu0 %v3229_v2  ;;  %v3288_v2 = vld [vmem:[#allocation2 + $0x244] ss:$8 sps:$4 sm:$0xff]  }
  0xf8   :  { %996 = vmatprep.subr.bf16.mxu0 %v3234_v3  ;;  %v3385_v3 = vld [vmem:[%s4213_s6 + $0xb0] ss:$8 sps:$4 sm:$0xff]  }
  0xf9   :  { %1368 = vmatpush1.bf16.msra.mxu1 %v3385_v3 }
  0xfb   :  { %997 = vmatpush1.bf16.msra.mxu0 %v3232_v4  ;;  %v3386_v4 = vld [vmem:[%s4213_s6 + $0xc4] ss:$8 sps:$4 sm:$0xff]  }
  0xfc   :  { %998 = vmatprep.subr.bf16.mxu0 %v3237_v5  ;;  %v3286_v5 = vld [vmem:[#allocation2 + $0x240] ss:$8 sps:$4 sm:$0xff]   ;;  %1369 = vmatprep.subr.bf16.mxu1 %v3386_v4 }
  0xff   :  { %999 = vmatpush1.bf16.msra.mxu0 %v3235_v6  ;;  %v3291_v6 = vld [vmem:[#allocation2 + $0x254] ss:$8 sps:$4 sm:$0xff]  }
 0x100   :  { %1000 = vmatprep.subr.bf16.mxu0 %v3240_v7  ;;  %v3388_v7 = vld [vmem:[%s4213_s6 + $0xc0] ss:$8 sps:$4 sm:$0xff]  }
 0x101   :  { %1370 = vmatpush1.bf16.msra.mxu1 %v3388_v7 }
 0x103   :  { %1001 = vmatpush1.bf16.msra.mxu0 %v3238_v8  ;;  %v3389_v8 = vld [vmem:[%s4213_s6 + $0xd4] ss:$8 sps:$4 sm:$0xff]  }
 0x104   :  { %1002 = vmatprep.subr.bf16.mxu0 %v3243_v9  ;;  %v3289_v9 = vld [vmem:[#allocation2 + $0x250] ss:$8 sps:$4 sm:$0xff]   ;;  %1371 = vmatprep.subr.bf16.mxu1 %v3389_v8 }
 0x107   :  { %1003 = vmatpush1.bf16.msra.mxu0 %v3241_v10  ;;  %v3294_v10 = vld [vmem:[#allocation2 + $0x264] ss:$8 sps:$4 sm:$0xff]  }
 0x108   :  { %1004 = vmatprep.subr.bf16.mxu0 %v3246_v11  ;;  %v3391_v11 = vld [vmem:[%s4213_s6 + $0xd0] ss:$8 sps:$4 sm:$0xff]  }
 0x109   :  { %1372 = vmatpush1.bf16.msra.mxu1 %v3391_v11 }
 0x10b   :  { %1005 = vmatpush1.bf16.msra.mxu0 %v3244_v12  ;;  %v3292_v12 = vld [vmem:[#allocation2 + $0x260] ss:$8 sps:$4 sm:$0xff]  }
 0x10c   :  { %1006 = vmatprep.subr.bf16.mxu0 %v3249_v13  ;;  %v3297_v13 = vld [vmem:[#allocation2 + $0x274] ss:$8 sps:$4 sm:$0xff]  }
 0x10f   :  { %1007 = vmatpush1.bf16.msra.mxu0 %v3247_v14  ;;  %v3295_v14 = vld [vmem:[#allocation2 + $0x270] ss:$8 sps:$4 sm:$0xff]  }
 0x110   :  { %1008 = vmatprep.subr.bf16.mxu0 %v3252_v15  ;;  %v3300_v15 = vld [vmem:[#allocation2 + $0x284] ss:$8 sps:$4 sm:$0xff]  }
 0x113   :  { %1009 = vmatpush1.bf16.msra.mxu0 %v3250_v19  ;;  %v3306_v19 = vld [vmem:[#allocation2 + $0x2a4] ss:$8 sps:$4 sm:$0xff]  }
 0x114   :  { %1010 = vmatprep.subr.bf16.mxu0 %v3255_v21  ;;  %v3304_v21 = vld [vmem:[#allocation2 + $0x2a0] ss:$8 sps:$4 sm:$0xff]  }
 0x117   :  { %1011 = vmatpush1.bf16.msra.mxu0 %v3253_v24  ;;  %v3312_v24 = vld [vmem:[#allocation2 + $0x2c4] ss:$8 sps:$4 sm:$0xff]  }
 0x118   :  { %1012 = vmatprep.subr.bf16.mxu0 %v3258_v25  ;;  %v3310_v25 = vld [vmem:[#allocation2 + $0x2c0] ss:$8 sps:$4 sm:$0xff]  }
 0x11b   :  { %1013 = vmatpush1.bf16.msra.mxu0 %v3256_v30  ;;  %v3318_v30 = vld [vmem:[#allocation2 + $0x2e4] ss:$8 sps:$4 sm:$0xff]  }
 0x11c   :  { %1014 = vmatprep.subr.bf16.mxu0 %v3261_v31  ;;  %v3316_v31 = vld [vmem:[#allocation2 + $0x2e0] ss:$8 sps:$4 sm:$0xff]  }
 0x11f   :  { %1015 = vmatpush1.bf16.msra.mxu0 %v3259_v34  ;;  %v3327_v34 = vld [vmem:[#allocation2 + $0x304] ss:$8 sps:$4 sm:$0xff]  }
 0x120   :  { %1016 = vmatprep.subr.bf16.mxu0 %v3264_v35  ;;  %v3322_v35 = vld [vmem:[%s4207_s0 + $0x10] ss:$28 sps:$4 sm:$0xff]  }
 0x123   :  { %1017 = vmatpush1.bf16.msra.mxu0 %v3262_v38  ;;  %v3328_v38 = vld [vmem:[#allocation2 + $0x310] ss:$8 sps:$4 sm:$0xff]  }
 0x124   :  { %1018 = vmatprep.subr.bf16.mxu0 %v3267_v39  ;;  %v3333_v39 = vld [vmem:[#allocation2 + $0x324] ss:$8 sps:$4 sm:$0xff]  }
 0x127   :  { %1019 = vmatpush1.bf16.msra.mxu0 %v3265_v42  ;;  %v3334_v42 = vld [vmem:[#allocation2 + $0x330] ss:$8 sps:$4 sm:$0xff]  }
 0x128   :  { %1020 = vmatprep.subr.bf16.mxu0 %v3270_v43  ;;  %v3339_v43 = vld [vmem:[#allocation2 + $0x344] ss:$8 sps:$4 sm:$0xff]  }
 0x12b   :  { %1021 = vmatpush1.bf16.msra.mxu0 %v3268_v46  ;;  %v3340_v46 = vld [vmem:[#allocation2 + $0x350] ss:$8 sps:$4 sm:$0xff]  }
 0x12c   :  { %1033 = vmatprep.subr.bf16.mxu0 %v3276_v47  ;;  %v3345_v47 = vld [vmem:[#allocation2 + $0x364] ss:$8 sps:$4 sm:$0xff]  }
 0x12e   :  { %1023 = vmatmul.mubr.bf16.vlgmr.msra.gmra.mrb[0].mxu0 %v3271_v49  ;;  %v3348_v49 = vld [vmem:[#allocation2 + $0x374] ss:$8 sps:$4 sm:$0xff]  }
 0x12f   :  { %1034 = vmatpush1.bf16.msra.mxu0 %v3274_v51  ;;  %1065 = vmatprep.mubr.bf16.mxu0 %v3324_v52  ;;  %v3349_v51 = vld [vmem:[%s4207_s0 + $0x18] ss:$28 sps:$4 sm:$0xff]   ;;  %v3392_v52 = vld [vmem:[%s4213_s6 + $0xe4] ss:$8 sps:$4 sm:$0xff]  }
 0x130   :  { %1035 = vmatprep.subr.bf16.mxu0 %v3279_v53  ;;  %v3394_v53 = vld [vmem:[%s4213_s6 + $0xe0] ss:$8 sps:$4 sm:$0xff]   ;;  %1373 = vmatprep.subr.bf16.mxu1 %v3392_v52  ;;  %v3469_v52 = vld [vmem:[#allocation4 + $0xbc] ss:$28 sps:$4 sm:$0xff]  }
 0x131   :  { %1374 = vmatpush1.bf16.msra.mxu1 %v3394_v53  ;;  %v3473_v53 = vld [vmem:[#allocation4 + $0xf0] ss:$28 sps:$4 sm:$0xff]  }
 0x132   :  { %1375 = vmatprep.subr.bf16.mxu1 %v3395_v54  ;;  %v3475_v54 = vld [vmem:[#allocation4 + $0xf4] ss:$28 sps:$4 sm:$0xff]  }
 0x133   :  { %1036 = vmatpush1.bf16.msra.mxu0 %v3277_v56  ;;  %v3400_v56 = vld [vmem:[%s4217_s10 + $0x4] ss:$8 sps:$4 sm:$0xff]  }
 0x134   :  { %1037 = vmatprep.subr.bf16.mxu0 %v3282_v57  ;;  %v4007_v57 = vshrl.u32 %v77_v20, 7 }
 0x135   :  { %1376 = vmatpush1.bf16.msra.mxu1 %v3397_v55  ;;  %v3479_v55 = vld [vmem:[#allocation4 + $0x128] ss:$28 sps:$4 sm:$0xff]  }
 0x136   :  { %1513 = vmatprep.subr.bf16.mxu1 %v3400_v56  ;;  %v4010_v58 = vsub.s32 0, %v4007_v57  ;;  %v3481_v56 = vld [vmem:[#allocation4 + $0x12c] ss:$28 sps:$4 sm:$0xff]  }
 0x137   :  { %1038 = vmatpush1.bf16.msra.mxu0 %v3280_v60  ;;  %v4016_v60 = vsub.s32 1, %v4007_v57 }
 0x138   :  { %1039 = vmatprep.subr.bf16.mxu0 %v3285_v61  ;;  %v1124_v61 = vrot.slane %v1119_v59, %v4010_v58 }
 0x139   :  { %v1128_v62 = vrot.slane %v1119_v59, %v4016_v60  ;;  %v3485_v59 = vld [vmem:[#allocation4 + $0x160] ss:$28 sps:$4 sm:$0xff]  }
 0x13b   :  { %1040 = vmatpush1.bf16.msra.mxu0 %v3283_v1 }
 0x13c   :  { %1041 = vmatprep.subr.bf16.mxu0 %v3288_v2 }
 0x13f   :  { %1042 = vmatpush1.bf16.msra.mxu0 %v3286_v5 }
 0x140   :  { %1043 = vmatprep.subr.bf16.mxu0 %v3291_v6 }
 0x143   :  { %1044 = vmatpush1.bf16.msra.mxu0 %v3289_v9 }
 0x144   :  { %1045 = vmatprep.subr.bf16.mxu0 %v3294_v10 }
 0x147   :  { %1046 = vmatpush1.bf16.msra.mxu0 %v3292_v12 }
 0x148   :  { %1047 = vmatprep.subr.bf16.mxu0 %v3297_v13  ;;  %v3398_v13 = vld [vmem:[%s4217_s10] ss:$8 sps:$4 sm:$0xff]  }
 0x14b   :  { %1048 = vmatpush1.bf16.msra.mxu0 %v3295_v14  ;;  %v3403_v14 = vld [vmem:[%s4217_s10 + $0x14] ss:$8 sps:$4 sm:$0xff]  }
 0x14c   :  { %1049 = vmatprep.subr.bf16.mxu0 %v3300_v15  ;;  %v3401_v15 = vld [vmem:[%s4217_s10 + $0x10] ss:$8 sps:$4 sm:$0xff]  }
 0x14f   :  { %1050 = vmatpush1.bf16.msra.mxu0 %v3298_v16  ;;  %v3406_v16 = vld [vmem:[%s4217_s10 + $0x24] ss:$8 sps:$4 sm:$0xff]  }
 0x150   :  { %1051 = vmatprep.subr.bf16.mxu0 %v3303_v17  ;;  %v3404_v17 = vld [vmem:[%s4217_s10 + $0x20] ss:$8 sps:$4 sm:$0xff]  }
 0x153   :  { %1052 = vmatpush1.bf16.msra.mxu0 %v3301_v18  ;;  %v3409_v18 = vld [vmem:[%s4217_s10 + $0x34] ss:$8 sps:$4 sm:$0xff]  }
 0x154   :  { %1053 = vmatprep.subr.bf16.mxu0 %v3306_v19  ;;  %v3407_v19 = vld [vmem:[%s4217_s10 + $0x30] ss:$8 sps:$4 sm:$0xff]  }
 0x157   :  { %1054 = vmatpush1.bf16.msra.mxu0 %v3304_v21  ;;  %v3412_v21 = vld [vmem:[%s4217_s10 + $0x44] ss:$8 sps:$4 sm:$0xff]  }
 0x158   :  { %1055 = vmatprep.subr.bf16.mxu0 %v3309_v22  ;;  %v3410_v22 = vld [vmem:[%s4217_s10 + $0x40] ss:$8 sps:$4 sm:$0xff]  }
 0x15b   :  { %1056 = vmatpush1.bf16.msra.mxu0 %v3307_v23  ;;  %v3415_v23 = vld [vmem:[%s4217_s10 + $0x54] ss:$8 sps:$4 sm:$0xff]  }
 0x15c   :  { %1057 = vmatprep.subr.bf16.mxu0 %v3312_v24  ;;  %v3413_v24 = vld [vmem:[%s4217_s10 + $0x50] ss:$8 sps:$4 sm:$0xff]  }
 0x15f   :  { %1058 = vmatpush1.bf16.msra.mxu0 %v3310_v25  ;;  %v3418_v25 = vld [vmem:[%s4217_s10 + $0x64] ss:$8 sps:$4 sm:$0xff]  }
 0x160   :  { %1059 = vmatprep.subr.bf16.mxu0 %v3315_v26  ;;  %v3416_v26 = vld [vmem:[%s4217_s10 + $0x60] ss:$8 sps:$4 sm:$0xff]  }
 0x163   :  { %1060 = vmatpush1.bf16.msra.mxu0 %v3313_v29  ;;  %v3421_v29 = vld [vmem:[%s4217_s10 + $0x74] ss:$8 sps:$4 sm:$0xff]  }
 0x164   :  { %1061 = vmatprep.subr.bf16.mxu0 %v3318_v30  ;;  %v3419_v30 = vld [vmem:[%s4217_s10 + $0x70] ss:$8 sps:$4 sm:$0xff]  }
 0x167   :  { %1062 = vmatpush1.bf16.msra.mxu0 %v3316_v31  ;;  %v3424_v31 = vld [vmem:[%s4215_s8 + $0x4] ss:$8 sps:$4 sm:$0xff]  }
 0x168   :  { %1063 = vmatprep.subr.bf16.mxu0 %v3321_v32  ;;  %v3422_v32 = vld [vmem:[%s4215_s8] ss:$8 sps:$4 sm:$0xff]  }
 0x16b   :  { %1064 = vmatpush1.bf16.msra.mxu0 %v3319_v33  ;;  %v3427_v33 = vld [vmem:[%s4215_s8 + $0x14] ss:$8 sps:$4 sm:$0xff]  }
 0x16c   :  { %1076 = vmatprep.subr.bf16.mxu0 %v3327_v34  ;;  %v3425_v34 = vld [vmem:[%s4215_s8 + $0x10] ss:$8 sps:$4 sm:$0xff]  }
 0x16e   :  { %1066 = vmatmul.mubr.bf16.vlgmr.msra.gmra.mrb[0].mxu0 %v3322_v35  ;;  %v3430_v35 = vld [vmem:[%s4215_s8 + $0x24] ss:$8 sps:$4 sm:$0xff]  }
 0x16f   :  { %1077 = vmatpush1.bf16.msra.mxu0 %v3325_v36  ;;  %1108 = vmatprep.mubr.bf16.mxu0 %v3720_v0  ;;  %v3428_v36 = vld [vmem:[%s4215_s8 + $0x20] ss:$8 sps:$4 sm:$0xff]  }
 0x170   :  { %1078 = vmatprep.subr.bf16.mxu0 %v3330_v37  ;;  %v3436_v37 = vld [vmem:[%s4215_s8 + $0x44] ss:$8 sps:$4 sm:$0xff]  }
 0x173   :  { %1079 = vmatpush1.bf16.msra.mxu0 %v3328_v38  ;;  %v3439_v38 = vld [vmem:[%s4215_s8 + $0x54] ss:$8 sps:$4 sm:$0xff]  }
 0x174   :  { %1080 = vmatprep.subr.bf16.mxu0 %v3333_v39  ;;  %v3437_v39 = vld [vmem:[%s4215_s8 + $0x50] ss:$8 sps:$4 sm:$0xff]  }
 0x177   :  { %1081 = vmatpush1.bf16.msra.mxu0 %v3331_v40  ;;  %v3442_v40 = vld [vmem:[%s4215_s8 + $0x64] ss:$8 sps:$4 sm:$0xff]  }
 0x178   :  { %1082 = vmatprep.subr.bf16.mxu0 %v3336_v41  ;;  %v3440_v41 = vld [vmem:[%s4215_s8 + $0x60] ss:$8 sps:$4 sm:$0xff]  }
 0x17b   :  { %1083 = vmatpush1.bf16.msra.mxu0 %v3334_v42  ;;  %v3445_v42 = vld [vmem:[%s4215_s8 + $0x74] ss:$8 sps:$4 sm:$0xff]  }
 0x17c   :  { %1084 = vmatprep.subr.bf16.mxu0 %v3339_v43  ;;  %v3443_v43 = vld [vmem:[%s4215_s8 + $0x70] ss:$8 sps:$4 sm:$0xff]  }
 0x17f   :  { %1085 = vmatpush1.bf16.msra.mxu0 %v3337_v44  ;;  %v3448_v44 = vld [vmem:[#allocation4 + $0x4] ss:$28 sps:$4 sm:$0xff]  }
 0x180   :  { %1086 = vmatprep.subr.bf16.mxu0 %v3342_v45  ;;  %v3449_v45 = vld [vmem:[#allocation4 + $0x10] ss:$28 sps:$4 sm:$0xff]  }
 0x183   :  { %1087 = vmatpush1.bf16.msra.mxu0 %v3340_v46  ;;  %v3451_v46 = vld [vmem:[#allocation4 + $0x14] ss:$28 sps:$4 sm:$0xff]  }
 0x184   :  { %1088 = vmatprep.subr.bf16.mxu0 %v3345_v47  ;;  %v3455_v47 = vld [vmem:[#allocation4 + $0x48] ss:$28 sps:$4 sm:$0xff]  }
 0x187   :  { %1089 = vmatpush1.bf16.msra.mxu0 %v3343_v48  ;;  %v3457_v48 = vld [vmem:[#allocation4 + $0x4c] ss:$28 sps:$4 sm:$0xff]  }
 0x188   :  { %1090 = vmatprep.subr.bf16.mxu0 %v3348_v49  ;;  %v3461_v49 = vld [vmem:[#allocation4 + $0x80] ss:$28 sps:$4 sm:$0xff]  }
 0x18b   :  { %1091 = vmatpush1.bf16.msra.mxu0 %v3346_v50  ;;  %v3463_v50 = vld [vmem:[#allocation4 + $0x84] ss:$28 sps:$4 sm:$0xff]  }
 0x18c   :  { %2528 = vmatprep.subr.bf16.mxu0 %v3451_v46  ;;  %v3476_v46 = vld [vmem:[#allocation4 + $0x118] ss:$28 sps:$4 sm:$0xff]  }
 0x18e   :  { %1109 = vmatmul.mubr.bf16.vlgmr.msra.gmra.mrb[0].mxu0 %v3349_v51  ;;  %v3467_v51 = vld [vmem:[#allocation4 + $0xb8] ss:$28 sps:$4 sm:$0xff]  }
 0x18f   :  { %2529 = vmatpush1.bf16.msra.mxu0 %v3449_v45  ;;  %v3478_v45 = vld [vmem:[#allocation4 + $0x11c] ss:$28 sps:$4 sm:$0xff]  }
 0x190   :  { %2530 = vmatprep.subr.bf16.mxu0 %v3457_v48  ;;  %v3482_v48 = vld [vmem:[#allocation4 + $0x150] ss:$28 sps:$4 sm:$0xff]  }
 0x193   :  { %2531 = vmatpush1.bf16.msra.mxu0 %v3455_v47  ;;  %v3484_v47 = vld [vmem:[#allocation4 + $0x154] ss:$28 sps:$4 sm:$0xff]  }
 0x194   :  { %2532 = vmatprep.subr.bf16.mxu0 %v3463_v50  ;;  %v3488_v50 = vld [vmem:[#allocation4 + $0x188] ss:$28 sps:$4 sm:$0xff]  }
 0x197   :  { %2533 = vmatpush1.bf16.msra.mxu0 %v3461_v49  ;;  %v3490_v49 = vld [vmem:[#allocation4 + $0x18c] ss:$28 sps:$4 sm:$0xff]  }
 0x198   :  { %2534 = vmatprep.subr.bf16.mxu0 %v3469_v52  ;;  %v3494_v52 = vld [vmem:[#allocation4 + $0x1c0] ss:$28 sps:$4 sm:$0xff]  }
 0x19b   :  { %2535 = vmatpush1.bf16.msra.mxu0 %v3467_v51  ;;  %v3496_v51 = vld [vmem:[#allocation4 + $0x1c4] ss:$28 sps:$4 sm:$0xff]  }
 0x19c   :  { %2536 = vmatprep.subr.bf16.mxu0 %v3475_v54  ;;  %v3500_v54 = vld [vmem:[#allocation4 + $0x1f8] ss:$28 sps:$4 sm:$0xff]  }
 0x19f   :  { %2537 = vmatpush1.bf16.msra.mxu0 %v3473_v53  ;;  %v3502_v53 = vld [vmem:[#allocation4 + $0x1fc] ss:$28 sps:$4 sm:$0xff]  }
 0x1a0   :  { %2538 = vmatprep.subr.bf16.mxu0 %v3481_v56  ;;  %v3506_v56 = vld [vmem:[#allocation4 + $0x230] ss:$28 sps:$4 sm:$0xff]  }
 0x1a3   :  { %2539 = vmatpush1.bf16.msra.mxu0 %v3479_v55  ;;  %v3508_v55 = vld [vmem:[#allocation4 + $0x234] ss:$28 sps:$4 sm:$0xff]  }
 0x261   :  { %v1110_v63 = vpop.f32.mrb[0].mxu0 }
 0x262   :  { %v1131_v1 = vadd.f32 %v1124_v61, %v1110_v63  ;;  %v1112_v2 = vpop.f32.mrb[1].mxu0  ;;  %v3493_v63 = vld [vmem:[#allocation4 + $0x19c] ss:$28 sps:$4 sm:$0xff]  }
 0x263   :  { %v1132_v3 = vadd.f32 %v1128_v62, %v1112_v2  ;;  %v1114_v20 = vpop.f32.mrb[2].mxu0  ;;  %v3499_v2 = vld [vmem:[#allocation4 + $0x1d4] ss:$28 sps:$4 sm:$0xff]  }
 0x264   :  { %v1133_v4 = vadd.f32 %v1124_v61, %v1114_v20  ;;  %v1116_v5 = vpop.f32.mrb[3].mxu0  ;;  %v1135_v7 = vmax.f32 %v1131_v1, 0.0  ;;  %v3487_v61 = vld [vmem:[#allocation4 + $0x164] ss:$28 sps:$4 sm:$0xff]   ;;  %v3497_v1 = vld [vmem:[#allocation4 + $0x1d0] ss:$28 sps:$4 sm:$0xff]  }
 0x265   :  { %v1134_v6 = vadd.f32 %v1128_v62, %v1116_v5  ;;  %v1136_v9 = vmax.f32 %v1132_v3, 0.0  ;;  %2540 = vmatprep.subr.bf16.mxu0 %v3487_v61  ;;  %v3491_v62 = vld [vmem:[#allocation4 + $0x198] ss:$28 sps:$4 sm:$0xff]   ;;  %v3503_v3 = vld [vmem:[#allocation4 + $0x208] ss:$28 sps:$4 sm:$0xff]  }
 0x266   :  { %v1137_v8 = vmax.f32 %v1133_v4, 0.0  ;;  %2541 = vmatpush1.bf16.msra.mxu0 %v3485_v59  ;;  %v3505_v20 = vld [vmem:[#allocation4 + $0x20c] ss:$28 sps:$4 sm:$0xff]   ;;  %v3509_v4 = vld [vmem:[#allocation4 + $0x240] ss:$28 sps:$4 sm:$0xff]  }
 0x267   :  { %v1138_v10 = vmax.f32 %v1134_v6, 0.0  ;;  %2542 = vmatprep.subr.bf16.mxu0 %v3493_v63  ;;  %v3511_v5 = vld [vmem:[#allocation4 + $0x244] ss:$28 sps:$4 sm:$0xff]   ;;  %v3515_v6 = vld [vmem:[#allocation4 + $0x278] ss:$28 sps:$4 sm:$0xff]  }
 0x268   :  { %v1139_v11 = vpack.c.bf16 %v1137_v8, %v1135_v7  ;;  %v3517_v7 = vld [vmem:[#allocation4 + $0x27c] ss:$28 sps:$4 sm:$0xff]   ;;  %v3521_v8 = vld [vmem:[#allocation4 + $0x2b0] ss:$28 sps:$4 sm:$0xff]   ;;  %v3512_v61 = vld [vmem:[#allocation4 + $0x268] ss:$28 sps:$4 sm:$0xff]  }
 0x269   :  { %v1140_v12 = vpack.c.bf16 %v1138_v10, %v1136_v9  ;;  %v3523_v9 = vld [vmem:[#allocation4 + $0x2b4] ss:$28 sps:$4 sm:$0xff]   ;;  %v3527_v10 = vld [vmem:[#allocation4 + $0x2e8] ss:$28 sps:$4 sm:$0xff]   ;;  %v3518_v63 = vld [vmem:[#allocation4 + $0x2a0] ss:$28 sps:$4 sm:$0xff]  }
 0x26a   :  { %2543 = vmatpush1.bf16.msra.mxu0 %v3491_v62  ;;  %v3514_v59 = vld [vmem:[#allocation4 + $0x26c] ss:$28 sps:$4 sm:$0xff]   ;;  %v3520_v62 = vld [vmem:[#allocation4 + $0x2a4] ss:$28 sps:$4 sm:$0xff]  }
 0x26b   :  { %1377 = vmatprep.mubr.bf16.mxu1 %v1140_v12  ;;  %2544 = vmatprep.subr.bf16.mxu0 %v3499_v2  ;;  %v1173_v12 = vld [vmem:[%s4214_s7] sm:$0x3]  ;;  %v3524_v2 = vld [vmem:[#allocation4 + $0x2d8] ss:$28 sps:$4 sm:$0xff]  }
 0x26c   :  { %1378 = vmatmul.mubr.bf16.vlgmr.msra.gmra.mrb[0].mxu1 %v1139_v11  ;;  %v3529_v11 = vld [vmem:[#allocation4 + $0x2ec] ss:$28 sps:$4 sm:$0xff]  }
 0x26d   :  { %1514 = vmatpush1.bf16.msra.mxu1 %v3398_v13  ;;  %1545 = vmatprep.mubr.bf16.mxu1 %v3720_v0  ;;  %v1178_v13 = vrot.slane %v1173_v12, %v4010_v58 }
 0x26e   :  { %1515 = vmatprep.subr.bf16.mxu1 %v3403_v14  ;;  %2545 = vmatpush1.bf16.msra.mxu0 %v3497_v1  ;;  %v1182_v14 = vrot.slane %v1173_v12, %v4016_v60  ;;  %v3526_v1 = vld [vmem:[#allocation4 + $0x2dc] ss:$28 sps:$4 sm:$0xff]  }
 0x26f   :  { %2546 = vmatprep.subr.bf16.mxu0 %v3505_v20  ;;  %v3530_v20 = vld [vmem:[#allocation4 + $0x310] ss:$28 sps:$4 sm:$0xff]  }
 0x271   :  { %1516 = vmatpush1.bf16.msra.mxu1 %v3401_v15 }
 0x272   :  { %1517 = vmatprep.subr.bf16.mxu1 %v3406_v16  ;;  %2547 = vmatpush1.bf16.msra.mxu0 %v3503_v3  ;;  %v3532_v3 = vld [vmem:[#allocation4 + $0x314] ss:$28 sps:$4 sm:$0xff]  }
 0x273   :  { %2548 = vmatprep.subr.bf16.mxu0 %v3511_v5  ;;  %v3533_v5 = vld [vmem:[#allocation4 + $0x320] ss:$28 sps:$4 sm:$0xff]  }
 0x275   :  { %1518 = vmatpush1.bf16.msra.mxu1 %v3404_v17 }
 0x276   :  { %1519 = vmatprep.subr.bf16.mxu1 %v3409_v18  ;;  %2549 = vmatpush1.bf16.msra.mxu0 %v3509_v4  ;;  %v3535_v4 = vld [vmem:[#allocation4 + $0x324] ss:$28 sps:$4 sm:$0xff]  }
 0x277   :  { %2550 = vmatprep.subr.bf16.mxu0 %v3517_v7  ;;  %v3536_v7 = vld [vmem:[#allocation4 + $0x348] ss:$28 sps:$4 sm:$0xff]  }
 0x279   :  { %1520 = vmatpush1.bf16.msra.mxu1 %v3407_v19 }
 0x27a   :  { %1521 = vmatprep.subr.bf16.mxu1 %v3412_v21  ;;  %2551 = vmatpush1.bf16.msra.mxu0 %v3515_v6  ;;  %v3538_v6 = vld [vmem:[#allocation4 + $0x34c] ss:$28 sps:$4 sm:$0xff]  }
 0x27b   :  { %2552 = vmatprep.subr.bf16.mxu0 %v3523_v9  ;;  %v3539_v9 = vld [vmem:[#allocation4 + $0x358] ss:$28 sps:$4 sm:$0xff]  }
 0x27d   :  { %1522 = vmatpush1.bf16.msra.mxu1 %v3410_v22 }
 0x27e   :  { %1523 = vmatprep.subr.bf16.mxu1 %v3415_v23  ;;  %2553 = vmatpush1.bf16.msra.mxu0 %v3521_v8  ;;  %v3541_v8 = vld [vmem:[#allocation4 + $0x35c] ss:$28 sps:$4 sm:$0xff]  }
 0x27f   :  { %2554 = vmatprep.subr.bf16.mxu0 %v3529_v11  ;;  %v1679_v11 = vld [vmem:[%s4216_s9] sm:$0x3] }
 0x280   :  { %v1684_v12 = vrot.slane %v1679_v11, %v4010_v58 }
 0x281   :  { %1524 = vmatpush1.bf16.msra.mxu1 %v3413_v24 }
 0x282   :  { %1525 = vmatprep.subr.bf16.mxu1 %v3418_v25  ;;  %2555 = vmatpush1.bf16.msra.mxu0 %v3527_v10  ;;  %v3544_v10 = vld [vmem:[#allocation4 + $0xc] ss:$28 sps:$4 sm:$0xff]  }
 0x283   :  { %2556 = vmatprep.subr.bf16.mxu0 %v3535_v4  ;;  %v3596_v4 = vld [vmem:[#allocation4 + $0x280] ss:$28 sps:$4 sm:$0xff]  }
 0x285   :  { %1526 = vmatpush1.bf16.msra.mxu1 %v3416_v26 }
 0x286   :  { %1527 = vmatprep.subr.bf16.mxu1 %v3421_v29  ;;  %2557 = vmatpush1.bf16.msra.mxu0 %v3533_v5  ;;  %v3597_v5 = vld [vmem:[#allocation4 + $0xc0] ss:$28 sps:$4 sm:$0xff]  }
 0x287   :  { %2558 = vmatprep.subr.bf16.mxu0 %v3541_v8  ;;  %v3600_v8 = vld [vmem:[#allocation4 + $0x2f0] ss:$28 sps:$4 sm:$0xff]  }
 0x289   :  { %1528 = vmatpush1.bf16.msra.mxu1 %v3419_v30  ;;  %v1388_v30 = vld [vmem:[%s4209_s2] sm:$0xff] }
 0x28a   :  { %1636 = vmatprep.subr.bf16.mxu1 %v3424_v31  ;;  %2559 = vmatpush1.bf16.msra.mxu0 %v3539_v9  ;;  %v3601_v9 = vld [vmem:[#allocation4 + $0x130] ss:$28 sps:$4 sm:$0xff]  }
 0x28c   :  { %2952 = vmatmul.mubr.msk.bf16.vlgmr.msra.gmra.mrb[4].mxu1 %vm3881_vm2, %v3721_v28  ;;  %v3434_v28 = vld [vmem:[%s4215_s8 + $0x40] ss:$8 sps:$4 sm:$0xff]  }
 0x28d   :  { %1637 = vmatpush1.bf16.msra.mxu1 %v3422_v32  ;;  %1668 = vmatprep.mubr.bf16.mxu1 %v3720_v0  ;;  %v3431_v0 = vld [vmem:[%s4215_s8 + $0x30] ss:$8 sps:$4 sm:$0xff]   ;;  %v1389_v32 = vld [vmem:[%s4209_s2 + $0x8] sm:$0xff] }
 0x28e   :  { %1638 = vmatprep.subr.bf16.mxu1 %v3427_v33 }
 0x291   :  { %1639 = vmatpush1.bf16.msra.mxu1 %v3425_v34 }
 0x292   :  { %1640 = vmatprep.subr.bf16.mxu1 %v3430_v35 }
 0x295   :  { %1641 = vmatpush1.bf16.msra.mxu1 %v3428_v36 }
 0x296   :  { %1642 = vmatprep.subr.bf16.mxu1 %v3433_v27 }
 0x299   :  { %1643 = vmatpush1.bf16.msra.mxu1 %v3431_v0  ;;  %v3446_v0 = vld [vmem:[#allocation4] ss:$28 sps:$4 sm:$0xff]  }
 0x29a   :  { %1644 = vmatprep.subr.bf16.mxu1 %v3436_v37  ;;  %v3454_v37 = vld [vmem:[#allocation4 + $0x3c] ss:$28 sps:$4 sm:$0xff]  }
 0x29d   :  { %1645 = vmatpush1.bf16.msra.mxu1 %v3434_v28 }
 0x29e   :  { %1646 = vmatprep.subr.bf16.mxu1 %v3439_v38  ;;  %v3452_v38 = vld [vmem:[#allocation4 + $0x38] ss:$28 sps:$4 sm:$0xff]  }
 0x2a1   :  { %1647 = vmatpush1.bf16.msra.mxu1 %v3437_v39  ;;  %v3460_v39 = vld [vmem:[#allocation4 + $0x74] ss:$28 sps:$4 sm:$0xff]  }
 0x2a2   :  { %1648 = vmatprep.subr.bf16.mxu1 %v3442_v40  ;;  %v3458_v40 = vld [vmem:[#allocation4 + $0x70] ss:$28 sps:$4 sm:$0xff]  }
 0x2a5   :  { %1649 = vmatpush1.bf16.msra.mxu1 %v3440_v41  ;;  %v3466_v41 = vld [vmem:[#allocation4 + $0xac] ss:$28 sps:$4 sm:$0xff]  }
 0x2a6   :  { %1650 = vmatprep.subr.bf16.mxu1 %v3445_v42  ;;  %v3464_v42 = vld [vmem:[#allocation4 + $0xa8] ss:$28 sps:$4 sm:$0xff]  }
 0x2a9   :  { %1651 = vmatpush1.bf16.msra.mxu1 %v3443_v43  ;;  %v3472_v43 = vld [vmem:[#allocation4 + $0xe4] ss:$28 sps:$4 sm:$0xff]  }
 0x2aa   :  { %2442 = vmatprep.subr.bf16.mxu1 %v3448_v44  ;;  %v3470_v44 = vld [vmem:[#allocation4 + $0xe0] ss:$28 sps:$4 sm:$0xff]  }
 0x33f   :  { %v1379_v15 = vpop.f32.mrb[0].mxu1 }
 0x340   :  { %v1380_v16 = vadd.f32 %v1379_v15, %v1178_v13  ;;  %v1381_v17 = vpop.f32.mrb[1].mxu1 }
 0x341   :  { %v1382_v18 = vadd.f32 %v1381_v17, %v1182_v14  ;;  %v1383_v19 = vpop.f32.mrb[2].mxu1 }
 0x342   :  { %2748 = vst [vmem:[%s4221_s14] sm:$0xff] %v1380_v16  ;;  %v1384_v21 = vadd.f32 %v1383_v19, %v1178_v13  ;;  %v1385_v22 = vpop.f32.mrb[3].mxu1  ;;  %v1688_v13 = vrot.slane %v1679_v11, %v4016_v60  ;;  %v3603_v11 = vld [vmem:[#allocation4 + $0x168] ss:$28 sps:$4 sm:$0xff]  }
 0x343   :  { %v1390_v23 = vmul.f32 0.5, %v1382_v18  ;;  %2749 = vst [vmem:[%s4221_s14 + $0x8] sm:$0xff] %v1382_v18  ;;  %v1386_v24 = vadd.f32 %v1385_v22, %v1182_v14 }
 0x344   :  { %2751 = vst [vmem:[%s4221_s14 + $0x18] sm:$0xff] %v1384_v21 }
 0x345   :  { %v1392_v25 = vmul.f32 1.442695, %v1390_v23  ;;  %v1391_v26 = vmul.f32 0.5, %v1386_v24  ;;  %2752 = vst [vmem:[%s4221_s14 + $0x20] sm:$0xff] %v1386_v24 }
 0x347   :  { %3606 = vpow2.f32 %v1392_v25  ;;  %v1394_v29 = vmul.f32 1.442695, %v1391_v26 }
 0x349   :  { %3608 = vpow2.f32 %v1394_v29 }
 0x351   :  { %v3607_v31 = vpop.eup %3606 }
 0x352   :  { %v1396_v33 = vmul.f32 %v3607_v31, %v1388_v30  ;;  %v3542_v31 = vld [vmem:[#allocation4 + $0x8] ss:$28 sps:$4 sm:$0xff]  }
 0x353   :  { %v3609_v34 = vpop.eup %3608 }
 0x354   :  { %v1397_v35 = vmul.f32 %v3609_v34, %v1389_v32  ;;  %v1398_v36 = vadd.f32 %v1396_v33, %v1380_v16  ;;  %v3547_v32 = vld [vmem:[#allocation4 + $0x44] ss:$28 sps:$4 sm:$0xff]   ;;  %v3550_v34 = vld [vmem:[#allocation4 + $0x7c] ss:$28 sps:$4 sm:$0xff]  }
 0x355   :  { %v3545_v33 = vld [vmem:[#allocation4 + $0x40] ss:$28 sps:$4 sm:$0xff]  }
 0x356   :  { %v1399_v27 = vadd.f32 %v1397_v35, %v1384_v21  ;;  %2750 = vst [vmem:[%s4221_s14 + $0x10] sm:$0xff] %v1398_v36  ;;  %v3548_v35 = vld [vmem:[#allocation4 + $0x78] ss:$28 sps:$4 sm:$0xff]  }
 0x358   :  { %v1400_v28 = vpack.c.bf16 %v1399_v27, %v1398_v36  ;;  %2753 = vst [vmem:[%s4221_s14 + $0x28] sm:$0xff] %v1399_v27  ;;  %v3553_v36 = vld [vmem:[#allocation4 + $0xb4] ss:$28 sps:$4 sm:$0xff]  }
 0x359   :  { %v3551_v27 = vld [vmem:[#allocation4 + $0xb0] ss:$28 sps:$4 sm:$0xff]  }
 0x35a   :  { %1669 = vmatmul.mubr.bf16.vlgmr.msra.gmra.mrb[4].mxu1 %v1400_v28  ;;  %v3554_v28 = vld [vmem:[#allocation4 + $0xe8] ss:$28 sps:$4 sm:$0xff]  }
 0x35b   :  { %2443 = vmatpush1.bf16.msra.mxu1 %v3446_v0  ;;  %v3556_v0 = vld [vmem:[#allocation4 + $0xec] ss:$28 sps:$4 sm:$0xff]  }
 0x35c   :  { %2444 = vmatprep.subr.bf16.mxu1 %v3454_v37  ;;  %v3559_v37 = vld [vmem:[#allocation4 + $0x124] ss:$28 sps:$4 sm:$0xff]  }
 0x35f   :  { %2445 = vmatpush1.bf16.msra.mxu1 %v3452_v38  ;;  %v3557_v38 = vld [vmem:[#allocation4 + $0x120] ss:$28 sps:$4 sm:$0xff]  }
 0x360   :  { %2446 = vmatprep.subr.bf16.mxu1 %v3460_v39  ;;  %v3562_v39 = vld [vmem:[#allocation4 + $0x15c] ss:$28 sps:$4 sm:$0xff]  }
 0x363   :  { %2447 = vmatpush1.bf16.msra.mxu1 %v3458_v40  ;;  %v3560_v40 = vld [vmem:[#allocation4 + $0x158] ss:$28 sps:$4 sm:$0xff]  }
 0x364   :  { %2448 = vmatprep.subr.bf16.mxu1 %v3466_v41  ;;  %v3565_v41 = vld [vmem:[#allocation4 + $0x194] ss:$28 sps:$4 sm:$0xff]  }
 0x367   :  { %2449 = vmatpush1.bf16.msra.mxu1 %v3464_v42  ;;  %v3563_v42 = vld [vmem:[#allocation4 + $0x190] ss:$28 sps:$4 sm:$0xff]  }
 0x368   :  { %2450 = vmatprep.subr.bf16.mxu1 %v3472_v43  ;;  %v3568_v43 = vld [vmem:[#allocation4 + $0x1cc] ss:$28 sps:$4 sm:$0xff]  }
 0x36b   :  { %2451 = vmatpush1.bf16.msra.mxu1 %v3470_v44  ;;  %v3566_v44 = vld [vmem:[#allocation4 + $0x1c8] ss:$28 sps:$4 sm:$0xff]  }
 0x36c   :  { %2452 = vmatprep.subr.bf16.mxu1 %v3478_v45  ;;  %v3571_v45 = vld [vmem:[#allocation4 + $0x204] ss:$28 sps:$4 sm:$0xff]  }
 0x36f   :  { %2453 = vmatpush1.bf16.msra.mxu1 %v3476_v46  ;;  %v3569_v46 = vld [vmem:[#allocation4 + $0x200] ss:$28 sps:$4 sm:$0xff]  }
 0x370   :  { %2454 = vmatprep.subr.bf16.mxu1 %v3484_v47  ;;  %v3574_v47 = vld [vmem:[#allocation4 + $0x23c] ss:$28 sps:$4 sm:$0xff]  }
 0x373   :  { %2455 = vmatpush1.bf16.msra.mxu1 %v3482_v48  ;;  %v3572_v48 = vld [vmem:[#allocation4 + $0x238] ss:$28 sps:$4 sm:$0xff]  }
 0x374   :  { %2456 = vmatprep.subr.bf16.mxu1 %v3490_v49  ;;  %v3577_v49 = vld [vmem:[#allocation4 + $0x274] ss:$28 sps:$4 sm:$0xff]  }
 0x377   :  { %2457 = vmatpush1.bf16.msra.mxu1 %v3488_v50  ;;  %v3575_v50 = vld [vmem:[#allocation4 + $0x270] ss:$28 sps:$4 sm:$0xff]  }
 0x378   :  { %2458 = vmatprep.subr.bf16.mxu1 %v3496_v51  ;;  %v3580_v51 = vld [vmem:[#allocation4 + $0x2ac] ss:$28 sps:$4 sm:$0xff]  }
 0x37b   :  { %2459 = vmatpush1.bf16.msra.mxu1 %v3494_v52  ;;  %v3578_v52 = vld [vmem:[#allocation4 + $0x2a8] ss:$28 sps:$4 sm:$0xff]  }
 0x37c   :  { %2460 = vmatprep.subr.bf16.mxu1 %v3502_v53  ;;  %v3583_v53 = vld [vmem:[#allocation4 + $0x2e4] ss:$28 sps:$4 sm:$0xff]  }
 0x37f   :  { %2461 = vmatpush1.bf16.msra.mxu1 %v3500_v54  ;;  %v3581_v54 = vld [vmem:[#allocation4 + $0x2e0] ss:$28 sps:$4 sm:$0xff]  }
 0x380   :  { %2462 = vmatprep.subr.bf16.mxu1 %v3508_v55  ;;  %v3586_v55 = vld [vmem:[#allocation4 + $0x31c] ss:$28 sps:$4 sm:$0xff]  }
 0x383   :  { %2463 = vmatpush1.bf16.msra.mxu1 %v3506_v56  ;;  %v3584_v56 = vld [vmem:[#allocation4 + $0x318] ss:$28 sps:$4 sm:$0xff]  }
 0x384   :  { %2464 = vmatprep.subr.bf16.mxu1 %v3514_v59  ;;  %v3589_v59 = vld [vmem:[#allocation4 + $0x354] ss:$28 sps:$4 sm:$0xff]  }
 0x387   :  { %2465 = vmatpush1.bf16.msra.mxu1 %v3512_v61  ;;  %v3587_v61 = vld [vmem:[#allocation4 + $0x350] ss:$28 sps:$4 sm:$0xff]  }
 0x388   :  { %2466 = vmatprep.subr.bf16.mxu1 %v3520_v62  ;;  %v3590_v62 = vld [vmem:[#allocation4 + $0x1d8] ss:$28 sps:$4 sm:$0xff]  }
 0x38b   :  { %2467 = vmatpush1.bf16.msra.mxu1 %v3518_v63  ;;  %v3591_v63 = vld [vmem:[#allocation4 + $0x18] ss:$28 sps:$4 sm:$0xff]  }
 0x38c   :  { %2468 = vmatprep.subr.bf16.mxu1 %v3526_v1  ;;  %v3592_v1 = vld [vmem:[#allocation4 + $0x210] ss:$28 sps:$4 sm:$0xff]  }
 0x38f   :  { %2469 = vmatpush1.bf16.msra.mxu1 %v3524_v2  ;;  %v3593_v2 = vld [vmem:[#allocation4 + $0x50] ss:$28 sps:$4 sm:$0xff]  }
 0x390   :  { %2470 = vmatprep.subr.bf16.mxu1 %v3532_v3  ;;  %v3594_v3 = vld [vmem:[#allocation4 + $0x248] ss:$28 sps:$4 sm:$0xff]  }
 0x393   :  { %2471 = vmatpush1.bf16.msra.mxu1 %v3530_v20  ;;  %v3595_v20 = vld [vmem:[#allocation4 + $0x88] ss:$28 sps:$4 sm:$0xff]  }
 0x394   :  { %2472 = vmatprep.subr.bf16.mxu1 %v3538_v6  ;;  %v3598_v6 = vld [vmem:[#allocation4 + $0x2b8] ss:$28 sps:$4 sm:$0xff]  }
 0x397   :  { %2473 = vmatpush1.bf16.msra.mxu1 %v3536_v7  ;;  %v3599_v7 = vld [vmem:[#allocation4 + $0xf8] ss:$28 sps:$4 sm:$0xff]  }
 0x398   :  { %2485 = vmatprep.subr.bf16.mxu1 %v3544_v10  ;;  %v3602_v10 = vld [vmem:[#allocation4 + $0x328] ss:$28 sps:$4 sm:$0xff]  }
 0x42d   :  { %v1670_v14 = vpop.f32.mrb[4].mxu1 }
 0x42e   :  { %v1691_v15 = vadd.f32 %v1684_v12, %v1670_v14  ;;  %v1672_v16 = vpop.f32.mrb[5].mxu1  ;;  %v1849_v14 = vsub.s32 4, %v4007_v57 }
 0x42f   :  { %v1692_v17 = vadd.f32 %v1688_v13, %v1672_v16  ;;  %v1674_v18 = vpop.f32.mrb[6].mxu1  ;;  %v1853_v16 = vsub.s32 5, %v4007_v57 }
 0x430   :  { %v1693_v19 = vadd.f32 %v1684_v12, %v1674_v18  ;;  %v1676_v21 = vpop.f32.mrb[7].mxu1  ;;  %v1695_v23 = vmax.f32 %v1691_v15, 0.0  ;;  %v3604_v12 = vld [vmem:[#allocation4 + $0x360] ss:$28 sps:$4 sm:$0xff]  }
 0x431   :  { %v1694_v22 = vadd.f32 %v1688_v13, %v1676_v21  ;;  %v1696_v25 = vmax.f32 %v1692_v17, 0.0  ;;  %v3605_v13 = vld [vmem:[#allocation4 + $0x1a0] ss:$28 sps:$4 sm:$0xff]  }
 0x432   :  { %v1697_v24 = vmax.f32 %v1693_v19, 0.0  ;;  %v4168_v15 = vld [vmem:[%s4219_s12] sm:$0xff] }
 0x433   :  { %v1698_v26 = vmax.f32 %v1694_v22, 0.0  ;;  %v1834_v17 = vrot.slane %v4168_v15, %v4010_v58  ;;  %v1850_v18 = vrot.slane %v4168_v15, %v1849_v14  ;;  %v1838_v19 = vrot.slane %v4168_v15, %v4016_v60 }
 0x434   :  { %v4152_v29 = vpack.c.bf16 %v1697_v24, %v1695_v23  ;;  %v1854_v21 = vrot.slane %v4168_v15, %v1853_v16 }
 0x435   :  { %v4154_v30 = vpack.c.bf16 %v1698_v26, %v1696_v25 }
 0x437   :  { %2474 = vmatprep.mubr.bf16.mxu1 %v4154_v30  ;;  %2560 = vmatprep.mubr.bf16.mxu0 %v4154_v30 }
 0x438   :  { %2475 = vmatmul.mubr.bf16.vlgmr.msra.gmra.mrb[8].mxu1 %v4152_v29  ;;  %2561 = vmatmul.mubr.bf16.vlgmr.msra.gmra.mrb[4].mxu0 %v4152_v29 }
 0x439   :  { %2486 = vmatpush1.bf16.msra.mxu1 %v3542_v31  ;;  %2517 = vmatprep.mubr.bf16.mxu1 %v4154_v30 }
 0x43a   :  { %2487 = vmatprep.subr.bf16.mxu1 %v3547_v32 }
 0x43d   :  { %2488 = vmatpush1.bf16.msra.mxu1 %v3545_v33 }
 0x43e   :  { %2489 = vmatprep.subr.bf16.mxu1 %v3550_v34 }
 0x441   :  { %2490 = vmatpush1.bf16.msra.mxu1 %v3548_v35 }
 0x442   :  { %2491 = vmatprep.subr.bf16.mxu1 %v3553_v36 }
 0x445   :  { %2492 = vmatpush1.bf16.msra.mxu1 %v3551_v27 }
 0x446   :  { %2493 = vmatprep.subr.bf16.mxu1 %v3556_v0 }
 0x449   :  { %2494 = vmatpush1.bf16.msra.mxu1 %v3554_v28 }
 0x44a   :  { %2495 = vmatprep.subr.bf16.mxu1 %v3559_v37 }
 0x44d   :  { %2496 = vmatpush1.bf16.msra.mxu1 %v3557_v38 }
 0x44e   :  { %2497 = vmatprep.subr.bf16.mxu1 %v3562_v39 }
 0x451   :  { %2498 = vmatpush1.bf16.msra.mxu1 %v3560_v40 }
 0x452   :  { %2499 = vmatprep.subr.bf16.mxu1 %v3565_v41 }
 0x455   :  { %2500 = vmatpush1.bf16.msra.mxu1 %v3563_v42 }
 0x456   :  { %2501 = vmatprep.subr.bf16.mxu1 %v3568_v43 }
 0x459   :  { %2502 = vmatpush1.bf16.msra.mxu1 %v3566_v44 }
 0x45a   :  { %2503 = vmatprep.subr.bf16.mxu1 %v3571_v45 }
 0x45d   :  { %2504 = vmatpush1.bf16.msra.mxu1 %v3569_v46 }
 0x45e   :  { %2505 = vmatprep.subr.bf16.mxu1 %v3574_v47 }
 0x461   :  { %2506 = vmatpush1.bf16.msra.mxu1 %v3572_v48 }
 0x462   :  { %2507 = vmatprep.subr.bf16.mxu1 %v3577_v49 }
 0x465   :  { %2508 = vmatpush1.bf16.msra.mxu1 %v3575_v50 }
 0x466   :  { %2509 = vmatprep.subr.bf16.mxu1 %v3580_v51 }
 0x469   :  { %2510 = vmatpush1.bf16.msra.mxu1 %v3578_v52 }
 0x46a   :  { %2511 = vmatprep.subr.bf16.mxu1 %v3583_v53 }
 0x46d   :  { %2512 = vmatpush1.bf16.msra.mxu1 %v3581_v54 }
 0x46e   :  { %2513 = vmatprep.subr.bf16.mxu1 %v3586_v55 }
 0x471   :  { %2514 = vmatpush1.bf16.msra.mxu1 %v3584_v56 }
 0x472   :  { %2515 = vmatprep.subr.bf16.mxu1 %v3589_v59 }
 0x475   :  { %2516 = vmatpush1.bf16.msra.mxu1 %v3587_v61 }
 0x476   :  { %3097 = vmatprep.subr.bf16.mxu1 %v3590_v62 }
 0x478   :  { %2518 = vmatmul.mubr.bf16.vlgmr.msra.gmra.mrb[12].mxu1 %v4152_v29 }
 0x479   :  { %3098 = vmatpush3.bf16.msra.mxu1 %v3591_v63  ;;  %2603 = vmatprep.mubr.bf16.mxu1 %v4154_v30 }
 0x47a   :  { %3099 = vmatprep.subr.bf16.mxu1 %v3592_v1 }
 0x47d   :  { %3100 = vmatpush3.bf16.msra.mxu1 %v3593_v2 }
 0x47e   :  { %3101 = vmatprep.subr.bf16.mxu1 %v3594_v3 }
 0x481   :  { %3102 = vmatpush3.bf16.msra.mxu1 %v3595_v20 }
 0x482   :  { %3103 = vmatprep.subr.bf16.mxu1 %v3596_v4 }
 0x485   :  { %3104 = vmatpush3.bf16.msra.mxu1 %v3597_v5 }
 0x486   :  { %3105 = vmatprep.subr.bf16.mxu1 %v3598_v6 }
 0x489   :  { %3106 = vmatpush3.bf16.msra.mxu1 %v3599_v7 }
 0x48a   :  { %3107 = vmatprep.subr.bf16.mxu1 %v3600_v8 }
 0x48d   :  { %3108 = vmatpush3.bf16.msra.mxu1 %v3601_v9 }
 0x48e   :  { %3109 = vmatprep.subr.bf16.mxu1 %v3602_v10 }
 0x491   :  { %3110 = vmatpush3.bf16.msra.mxu1 %v3603_v11 }
 0x492   :  { %3111 = vmatprep.subr.bf16.mxu1 %v3604_v12 }
 0x495   :  { %3112 = vmatpush3.bf16.msra.mxu1 %v3605_v13 }
 0x498   :  { %2604 = vmatmul.mubr.bf16.vlgmr.msra.gmra.mrb[16].mxu1 %v4152_v29 }
 0x50b   :  { %v2476_v22 = vpop.f32.mrb[8].mxu1  ;;  %v2562_v23 = vpop.f32.mrb[4].mxu0 }
 0x50c   :  { %v2477_v24 = vadd.f32 %v2476_v22, %v1834_v17  ;;  %v2563_v25 = vadd.f32 %v2562_v23, %v1850_v18  ;;  %v2478_v26 = vpop.f32.mrb[9].mxu1  ;;  %v2564_v29 = vpop.f32.mrb[5].mxu0 }
 0x50d   :  { %v2479_v30 = vadd.f32 %v2478_v26, %v1838_v19  ;;  %v2565_v31 = vadd.f32 %v2564_v29, %v1854_v21  ;;  %v2480_v32 = vpop.f32.mrb[10].mxu1  ;;  %v2566_v33 = vpop.f32.mrb[6].mxu0 }
 0x50e   :  { %v2612_v34 = vsub.f32 0.0, %v2477_v24  ;;  %v2616_v35 = vsub.f32 0.0, %v2563_v25  ;;  %v2481_v58 = vadd.f32 %v2480_v32, %v1834_v17  ;;  %v2567_v36 = vadd.f32 %v2566_v33, %v1850_v18  ;;  %v2482_v27 = vpop.f32.mrb[11].mxu1  ;;  %v2568_v0 = vpop.f32.mrb[7].mxu0 }
 0x50f   :  { %v2613_v28 = vsub.f32 0.0, %v2479_v30  ;;  %v2617_v60 = vsub.f32 0.0, %v2565_v31  ;;  %v2483_v37 = vadd.f32 %v2482_v27, %v1838_v19  ;;  %v2569_v38 = vadd.f32 %v2568_v0, %v1854_v21 }
 0x510   :  { %v2626_v39 = vmul.f32 1.442695, %v2612_v34  ;;  %v2634_v40 = vmul.f32 1.442695, %v2616_v35  ;;  %v2619_v41 = vsub.f32 0.0, %v2481_v58  ;;  %v2623_v42 = vsub.f32 0.0, %v2567_v36 }
 0x511   :  { %v2628_v43 = vmul.f32 1.442695, %v2613_v28  ;;  %v2636_v44 = vmul.f32 1.442695, %v2617_v60  ;;  %v2620_v45 = vsub.f32 0.0, %v2483_v37  ;;  %v2624_v46 = vsub.f32 0.0, %v2569_v38 }
 0x512   :  { %3610 = vpow2.f32 %v2626_v39  ;;  %v2640_v47 = vmul.f32 1.442695, %v2619_v41  ;;  %v2648_v48 = vmul.f32 1.442695, %v2623_v42  ;;  %v1841_v19 = vsub.s32 2, %v4007_v57 }
 0x513   :  { %3612 = vpow2.f32 %v2634_v40  ;;  %v2642_v49 = vmul.f32 1.442695, %v2620_v45  ;;  %v2650_v50 = vmul.f32 1.442695, %v2624_v46  ;;  %v1845_v21 = vsub.s32 3, %v4007_v57 }
 0x514   :  { %3614 = vpow2.f32 %v2628_v43  ;;  %v1842_v22 = vrot.slane %v4168_v15, %v1841_v19  ;;  %v1857_v45 = vsub.s32 6, %v4007_v57 }
 0x515   :  { %3616 = vpow2.f32 %v2636_v44  ;;  %v1846_v23 = vrot.slane %v4168_v15, %v1845_v21 }
 0x516   :  { %3618 = vpow2.f32 %v2640_v47 }
 0x517   :  { %3620 = vpow2.f32 %v2648_v48 }
 0x518   :  { %3622 = vpow2.f32 %v2642_v49 }
 0x519   :  { %3624 = vpow2.f32 %v2650_v50 }
 0x51c   :  { %v3611_v51 = vpop.eup %3610 }
 0x51d   :  { %v3613_v52 = vpop.eup %3612  ;;  %v2654_v53 = vadd.f32 1.0, %v3611_v51  ;;  %v1858_v51 = vrot.slane %v4168_v15, %v1857_v45 }
 0x51e   :  { %v3615_v54 = vpop.eup %3614  ;;  %v2658_v55 = vadd.f32 1.0, %v3613_v52 }
 0x51f   :  { %v3617_v56 = vpop.eup %3616  ;;  %3626 = vrcp.f32 %v2654_v53  ;;  %v2655_v59 = vadd.f32 1.0, %v3615_v54 }
 0x520   :  { %v3619_v61 = vpop.eup %3618  ;;  %3628 = vrcp.f32 %v2658_v55  ;;  %v2659_v62 = vadd.f32 1.0, %v3617_v56 }
 0x521   :  { %v3621_v63 = vpop.eup %3620  ;;  %3630 = vrcp.f32 %v2655_v59  ;;  %v2661_v1 = vadd.f32 1.0, %v3619_v61 }
 0x522   :  { %v3623_v2 = vpop.eup %3622  ;;  %3632 = vrcp.f32 %v2659_v62  ;;  %v2665_v3 = vadd.f32 1.0, %v3621_v63 }
 0x523   :  { %v3625_v20 = vpop.eup %3624  ;;  %3634 = vrcp.f32 %v2661_v1  ;;  %v2662_v4 = vadd.f32 1.0, %v3623_v2 }
 0x524   :  { %3636 = vrcp.f32 %v2665_v3  ;;  %v2666_v5 = vadd.f32 1.0, %v3625_v20 }
 0x525   :  { %3638 = vrcp.f32 %v2662_v4 }
 0x526   :  { %3640 = vrcp.f32 %v2666_v5 }
 0x529   :  { %v3627_v6 = vpop.eup %3626 }
 0x52a   :  { %v3629_v7 = vpop.eup %3628 }
 0x52b   :  { %v3631_v8 = vpop.eup %3630 }
 0x52c   :  { %v3633_v9 = vpop.eup %3632  ;;  %v3089_v10 = vpack.c.bf16 %v3631_v8, %v3627_v6 }
 0x52d   :  { %v3635_v11 = vpop.eup %3634  ;;  %v3091_v12 = vpack.c.bf16 %v3633_v9, %v3629_v7 }
 0x52e   :  { %v3637_v13 = vpop.eup %3636  ;;  %2740 = vst [vmem:[%s4220_s13] sm:$0xff] %v3089_v10 }
 0x52f   :  { %v3639_v14 = vpop.eup %3638  ;;  %2742 = vst [vmem:[%s4220_s13 + $0x10] sm:$0xff] %v3091_v12 }
 0x530   :  { %v3641_v16 = vpop.eup %3640  ;;  %v3093_v17 = vpack.c.bf16 %v3639_v14, %v3635_v11 }
 0x531   :  { %v3095_v18 = vpack.c.bf16 %v3641_v16, %v3637_v13 }
 0x532   :  { %2744 = vst [vmem:[%s4220_s13 + $0x1c] sm:$0xff] %v3093_v17 }
 0x533   :  { %2746 = vst [vmem:[%s4220_s13 + $0x2c] sm:$0xff] %v3095_v18 }
 0x54b   :  { %v2519_v24 = vpop.f32.mrb[12].mxu1 }
 0x54c   :  { %v2520_v25 = vadd.f32 %v2519_v24, %v1842_v22  ;;  %v2521_v26 = vpop.f32.mrb[13].mxu1 }
 0x54d   :  { %v2522_v29 = vadd.f32 %v2521_v26, %v1846_v23  ;;  %v2523_v30 = vpop.f32.mrb[14].mxu1 }
 0x54e   :  { %v2614_v31 = vsub.f32 0.0, %v2520_v25  ;;  %v2524_v32 = vadd.f32 %v2523_v30, %v1842_v22  ;;  %v2525_v33 = vpop.f32.mrb[15].mxu1 }
 0x54f   :  { %v2615_v34 = vsub.f32 0.0, %v2522_v29  ;;  %v2526_v35 = vadd.f32 %v2525_v33, %v1846_v23 }
 0x550   :  { %v2630_v58 = vmul.f32 1.442695, %v2614_v31  ;;  %v2621_v36 = vsub.f32 0.0, %v2524_v32 }
 0x551   :  { %v2632_v27 = vmul.f32 1.442695, %v2615_v34  ;;  %v2622_v0 = vsub.f32 0.0, %v2526_v35 }
 0x552   :  { %3642 = vpow2.f32 %v2630_v58  ;;  %v2644_v28 = vmul.f32 1.442695, %v2621_v36 }
 0x553   :  { %3644 = vpow2.f32 %v2632_v27  ;;  %v2646_v60 = vmul.f32 1.442695, %v2622_v0 }
 0x554   :  { %3646 = vpow2.f32 %v2644_v28 }
 0x555   :  { %3648 = vpow2.f32 %v2646_v60 }
 0x55c   :  { %v3643_v37 = vpop.eup %3642 }
 0x55d   :  { %v3645_v38 = vpop.eup %3644  ;;  %v2656_v39 = vadd.f32 1.0, %v3643_v37 }
 0x55e   :  { %v3647_v40 = vpop.eup %3646  ;;  %v2657_v41 = vadd.f32 1.0, %v3645_v38 }
 0x55f   :  { %v3649_v42 = vpop.eup %3648  ;;  %3650 = vrcp.f32 %v2656_v39  ;;  %v2663_v43 = vadd.f32 1.0, %v3647_v40 }
 0x560   :  { %3652 = vrcp.f32 %v2657_v41  ;;  %v2664_v44 = vadd.f32 1.0, %v3649_v42 }
 0x561   :  { %3654 = vrcp.f32 %v2663_v43 }
 0x562   :  { %3656 = vrcp.f32 %v2664_v44 }
 0x569   :  { %v3651_v46 = vpop.eup %3650 }
 0x56a   :  { %v3653_v47 = vpop.eup %3652 }
 0x56b   :  { %v3655_v48 = vpop.eup %3654  ;;  %v3090_v49 = vpack.c.bf16 %v3653_v47, %v3651_v46  ;;  %v3113_v50 = vpop.f32.mrb[16].mxu1 }
 0x56c   :  { %v3657_v52 = vpop.eup %3656  ;;  %v3114_v53 = vpop.f32.mrb[17].mxu1 }
 0x56d   :  { %2741 = vst [vmem:[%s4220_s13 + $0x8] sm:$0xff] %v3090_v49  ;;  %v3094_v54 = vpack.c.bf16 %v3657_v52, %v3655_v48  ;;  %v3115_v55 = vadd.f32 %v3114_v53, %v3113_v50  ;;  %v3116_v56 = vpop.f32.mrb[18].mxu1 }
 0x56e   :  { %v3117_v59 = vpop.f32.mrb[19].mxu1 }
 0x56f   :  { %2745 = vst [vmem:[%s4220_s13 + $0x24] sm:$0xff] %v3094_v54  ;;  %v2606_v57 = vadd.f32 %v3115_v55, %v1858_v51  ;;  %v3118_v61 = vadd.f32 %v3117_v59, %v3116_v56 }
 0x571   :  { %v2618_v62 = vsub.f32 0.0, %v2606_v57  ;;  %v2609_v63 = vadd.f32 %v3118_v61, %v1858_v51 }
 0x573   :  { %v2638_v1 = vmul.f32 1.442695, %v2618_v62  ;;  %v2625_v15 = vsub.f32 0.0, %v2609_v63 }
 0x575   :  { %3658 = vpow2.f32 %v2638_v1  ;;  %v2652_v2 = vmul.f32 1.442695, %v2625_v15 }
 0x577   :  { %3660 = vpow2.f32 %v2652_v2 }
 0x57f   :  { %v3659_v3 = vpop.eup %3658 }
 0x580   :  { %v2660_v20 = vadd.f32 1.0, %v3659_v3 }
 0x581   :  { %v3661_v4 = vpop.eup %3660 }
 0x582   :  { %3662 = vrcp.f32 %v2660_v20  ;;  %v2667_v5 = vadd.f32 1.0, %v3661_v4 }
 0x584   :  { %3664 = vrcp.f32 %v2667_v5 }
 0x58c   :  { %v3663_v6 = vpop.eup %3662 }
 0x58d   :  { %v3092_v7 = vpack.c.bf16 %v3663_v6, %v3663_v6 }
 0x58e   :  { %v3665_v8 = vpop.eup %3664 }
 0x58f   :  { %2743 = vst [vmem:[%s4220_s13 + $0x18] sm:$0xf] %v3092_v7  ;;  %v3096_v9 = vpack.c.bf16 %v3665_v8, %v3665_v8 }
 0x591   :  { %2747 = vst [vmem:[%s4220_s13 + $0x34] sm:$0xf] %v3096_v9 }
 0x592   :  { %2762 = vsyncpa [#allocation3], 1 }
 0x593   :  { %2763 = vsyncpa [#allocation5], 1 }

</bundles_post_ra>
